<compile_context>
chip_gen: v7x
topology: tpu7x:2x2x1
jax: 0.10.0
libtpu: 0.0.40
codegen_flags: <defaults>
</compile_context>

<pallas_src>
import functools
import math

import jax
import jax.numpy as jnp
import numpy as np
from jax.experimental import pallas as pl
from jax.experimental.pallas import tpu as pltpu


# ---------------------------------------------------------------------------
# In-kernel helpers
# ---------------------------------------------------------------------------
def _layernorm(y, g, b, eps=1e-5):
    mu = jnp.mean(y, axis=-1, keepdims=True)
    var = jnp.mean((y - mu) ** 2, axis=-1, keepdims=True)  # biased var (PyTorch LayerNorm)
    return (y - mu) * jax.lax.rsqrt(var + eps) * g + b


# ---------------------------------------------------------------------------
# Fully-fused kernel: embedding + PE + depth x (MHSA + LN + MLP + LN)
#                     + mean-pool + Linear + log_softmax
# Grid = (num_batch_blocks,), "parallel": each step handles BB batch rows; all weights
# are VMEM-resident with constant block indices (fetched once).
# ---------------------------------------------------------------------------
def fused_transformer_kernel(tok_ref, emb_ref, pe_ref, wqkv_ref, wu_ref, w1_ref,
                             w2_ref, vec_ref, wc_ref, bc_ref, o_ref, *,
                             depth, heads, k_dim, bb, seq, num_tokens):
    BB, T, K, H = bb, seq, k_dim, heads
    BT, HK = BB * T, heads * k_dim
    scale = 1.0 / math.sqrt(K)

    # ---- token embedding: in-kernel gather as a one-hot MXU matmul (no HBM x round-trip)
    tok = tok_ref[...].reshape(BT, 1)                                     # int32
    onehot = (tok == jax.lax.broadcasted_iota(jnp.int32, (BT, num_tokens), 1)
              ).astype(jnp.float32)                                       # (BT, NT)
    x = jnp.dot(onehot, emb_ref[...],
                preferred_element_type=jnp.float32) * math.sqrt(K)        # (BT, K)
    # PositionalEncoding indexed by *batch* (original module quirk): pe[b] bcast over T.
    x = (x.reshape(BB, T, K) + pe_ref[...]).reshape(BT, K)

    xf = x
    for d in range(depth):                                                # static unroll
        vec = vec_ref[d]                                                  # (8, 2K) packed
        bu, g1, bn1 = vec[0:1, 0:K], vec[1:2, 0:K], vec[2:3, 0:K]
        b1 = vec[3:4, :]                                                  # (1, 2K)
        b2, g2, bn2 = vec[4:5, 0:K], vec[5:6, 0:K], vec[6:7, 0:K]

        # Fused QKV projection: one wide bf16 MXU pass with N = 3*H*K.
        qkv = jnp.dot(xf.astype(jnp.bfloat16), wqkv_ref[d],
                      preferred_element_type=jnp.float32)                 # (BT, 3HK) f32

        # Head-batched attention: all H heads in one pair of leading-batch 3-D einsums.
        def to_heads(mat):                                                # (BT,HK)->(BB*H,T,K)
            return jnp.concatenate(
                [mat[:, h * K:(h + 1) * K].reshape(BB, T, K) for h in range(H)], axis=0)

        qh = to_heads(qkv[:, 0 * HK:1 * HK])
        kh = to_heads(qkv[:, 1 * HK:2 * HK])
        vh = to_heads(qkv[:, 2 * HK:3 * HK])

        s = jnp.einsum("xqd,xkd->xqk", qh, kh,
                       preferred_element_type=jnp.float32) * scale        # (BB*H, T, T)
        s = s - jnp.max(s, axis=-1, keepdims=True)
        p = jnp.exp(s)
        p = p / jnp.sum(p, axis=-1, keepdims=True)                        # exact softmax
        o = jnp.einsum("xqk,xkd->xqd", p, vh,
                       preferred_element_type=jnp.float32)                # (BB*H, T, K)

        # Heads back onto lanes -> ONE unify projection with contraction HK = 128.
        o_cat = jnp.concatenate(
            [o[h * BB:(h + 1) * BB].reshape(BT, K) for h in range(H)], axis=1)
        uni = jnp.dot(o_cat.astype(jnp.bfloat16), wu_ref[d],
                      preferred_element_type=jnp.float32) + bu            # (BT, K)

        x1 = _layernorm(uni + xf, g1, bn1)

        hid = jnp.maximum(
            jnp.dot(x1.astype(jnp.bfloat16), w1_ref[d],
                    preferred_element_type=jnp.float32) + b1, 0.0)        # (BT, 2K)
        ff = jnp.dot(hid.astype(jnp.bfloat16), w2_ref[d],
                     preferred_element_type=jnp.float32) + b2             # (BT, K)
        xf = _layernorm(ff + x1, g2, bn2)

    # ---- classification head: mean over sequence + Linear + log_softmax (f32) ----
    avg = jnp.mean(xf.reshape(BB, T, K), axis=1)                          # (BB, K)
    logits = jnp.dot(avg, wc_ref[...], preferred_element_type=jnp.float32) + bc_ref[...]
    z = logits - jnp.max(logits, axis=-1, keepdims=True)
    logp = z - jnp.log(jnp.sum(jnp.exp(z), axis=-1, keepdims=True))
    o_ref[...] = logp.reshape(BB, 1, logp.shape[-1])


def transformer_fused(tokens3, prep, *, heads, depth):
    B, T, _ = tokens3.shape
    NT, K = prep["emb"].shape
    NC = prep["wc"].shape[1]
    HK, H2 = heads * K, 2 * K

    # Batch-parallel grid: 2 steps when B is even so v7x's two TensorCores each take
    # half the batch (dimension_semantics=("parallel",)); serial but cheap on v5e/v6e.
    NB = 2 if (B % 2 == 0 and B >= 2) else 1
    BB = B // NB

    kernel = functools.partial(fused_transformer_kernel, depth=depth, heads=heads,
                               k_dim=K, bb=BB, seq=T, num_tokens=NT)

    out = pl.pallas_call(
        kernel,
        out_shape=jax.ShapeDtypeStruct((B, 1, NC), jnp.float32),
        grid=(NB,),
        in_specs=[
            pl.BlockSpec((BB, T, 1), lambda i: (i, 0, 0)),           # tokens (int32)
            pl.BlockSpec((NT, K), lambda i: (0, 0)),                 # embedding table (f32)
            pl.BlockSpec((BB, 1, K), lambda i: (i, 0, 0)),           # PE rows (batch-indexed)
            pl.BlockSpec((depth, K, 3 * HK), lambda i: (0, 0, 0)),   # fused wqkv (bf16)
            pl.BlockSpec((depth, HK, K), lambda i: (0, 0, 0)),       # wu (bf16)
            pl.BlockSpec((depth, K, H2), lambda i: (0, 0, 0)),       # w1 (bf16)
            pl.BlockSpec((depth, H2, K), lambda i: (0, 0, 0)),       # w2 (bf16)
            pl.BlockSpec((depth, 8, H2), lambda i: (0, 0, 0)),       # packed LN/bias vectors
            pl.BlockSpec((K, NC), lambda i: (0, 0)),                 # wc (f32)
            pl.BlockSpec((1, NC), lambda i: (0, 0)),                 # bc (f32)
        ],
        out_specs=pl.BlockSpec((BB, 1, NC), lambda i: (i, 0, 0)),
        compiler_params=pltpu.CompilerParams(
            dimension_semantics=("parallel",),
            vmem_limit_bytes=32 * 1024 * 1024,   # explicit headroom (footprint here ~1 MiB)
        ),
    )(tokens3, prep["emb"], prep["pe"], prep["wqkv"], prep["wu"], prep["w1"],
      prep["w2"], prep["vecs"], prep["wc"], prep["bc"])
    return out.reshape(B, NC)


# ---------------------------------------------------------------------------
# One-time parameter preparation (hoisted OUT of the forward path, per review)
# ---------------------------------------------------------------------------
def prepare_params(params):
    K = params["emb"].shape[1]
    H2 = 2 * K
    blocks = params["blocks"]

    def pad_row(v):
        v = v.reshape(1, -1)
        return jnp.pad(v, ((0, 0), (0, H2 - v.shape[1])))

    wqkv, wu, w1, w2, vecs = [], [], [], [], []
    for b in blocks:
        wqkv.append(jnp.concatenate([b["wq"], b["wk"], b["wv"]], axis=1))   # (K, 3*HK)
        wu.append(b["wu"]); w1.append(b["w1"]); w2.append(b["w2"])
        vecs.append(jnp.concatenate([                                        # (8, 2K) slab
            pad_row(b["bu"]), pad_row(b["g1"]), pad_row(b["bn1"]),
            b["b1"].reshape(1, H2), pad_row(b["b2"]), pad_row(b["g2"]),
            pad_row(b["bn2"]), jnp.zeros((1, H2), jnp.float32)], axis=0))

    return {
        "emb": params["emb"].astype(jnp.float32),        # (NT, K)
        "pe": params["pe"].astype(jnp.float32),          # (max_len, 1, K) — PyTorch buffer
        "wqkv": jnp.stack(wqkv).astype(jnp.bfloat16),    # (depth, K, 3*HK)
        "wu": jnp.stack(wu).astype(jnp.bfloat16),        # (depth, HK, K)
        "w1": jnp.stack(w1).astype(jnp.bfloat16),        # (depth, K, 2K)
        "w2": jnp.stack(w2).astype(jnp.bfloat16),        # (depth, 2K, K)
        "vecs": jnp.stack(vecs),                         # (depth, 8, 2K) f32
        "wc": params["wc"].astype(jnp.float32),          # (K, NC)
        "bc": params["bc"].reshape(1, -1).astype(jnp.float32),
    }


# ---------------------------------------------------------------------------
# Forward: ONE pallas_call; only a metadata reshape of the int tokens outside.
# ---------------------------------------------------------------------------
def transformer_forward(tokens, prep, *, heads, depth):
    B, T = tokens.shape
    tokens3 = tokens.astype(jnp.int32).reshape(B, T, 1)
    return transformer_fused(tokens3, prep, heads=heads, depth=depth)


# ---------------------------------------------------------------------------
# Pure-JAX f32 reference (for correctness check)
# ---------------------------------------------------------------------------
def reference_forward(tokens, params, heads, depth):
    K = params["emb"].shape[1]
    B, T = tokens.shape
    x = params["emb"][tokens] * math.sqrt(K)
    x = x + params["pe"][:B, :]                    # batch-indexed PE (original quirk)
    for d in range(depth):
        p = params["blocks"][d]
        q = (x @ p["wq"]).reshape(B, T, heads, K).transpose(0, 2, 1, 3)
        kk = (x @ p["wk"]).reshape(B, T, heads, K).transpose(0, 2, 1, 3)
        v = (x @ p["wv"]).reshape(B, T, heads, K).transpose(0, 2, 1, 3)
        s = jnp.einsum("bhtk,bhsk->bhts", q, kk) / math.sqrt(K)
        w = jax.nn.softmax(s, axis=-1)
        o = jnp.einsum("bhts,bhsk->bhtk", w, v).transpose(0, 2, 1, 3).reshape(B, T, heads * K)
        uni = o @ p["wu"] + p["bu"]
        x1 = _layernorm(uni + x, p["g1"], p["bn1"])
        ff = jnp.maximum(x1 @ p["w1"] + p["b1"], 0.0) @ p["w2"] + p["b2"]
        x = _layernorm(ff + x1, p["g2"], p["bn2"])
    avg = x.mean(axis=1)
    logits = avg @ params["wc"] + params["bc"]
    return jax.nn.log_softmax(logits, axis=1)


# ---------------------------------------------------------------------------
# Deterministic parameter initialization
# ---------------------------------------------------------------------------
def init_params(key, k, heads, depth, num_tokens, num_classes, max_len=512):
    keys = list(jax.random.split(key, 2 + depth * 8))
    it = iter(keys)

    def nrm(shape, scale=0.05):
        return (scale * jax.random.normal(next(it), shape)).astype(jnp.float32)

    params = {
        "emb": nrm((num_tokens, k), 1.0),
        "wc": nrm((k, num_classes)),
        "bc": jnp.zeros((num_classes,), jnp.float32),
    }
    blocks = []
    for _ in range(depth):
        blocks.append({
            "wq": nrm((k, heads * k)), "wk": nrm((k, heads * k)), "wv": nrm((k, heads * k)),
            "wu": nrm((heads * k, k)), "bu": jnp.zeros((k,), jnp.float32),
            "g1": jnp.ones((k,), jnp.float32), "bn1": jnp.zeros((k,), jnp.float32),
            "w1": nrm((k, 2 * k)), "b1": jnp.zeros((2 * k,), jnp.float32),
            "w2": nrm((2 * k, k)), "b2": jnp.zeros((k,), jnp.float32),
            "g2": jnp.ones((k,), jnp.float32), "bn2": jnp.zeros((k,), jnp.float32),
        })
    params["blocks"] = blocks

    # Positional-encoding buffer, exactly as in the PyTorch module: (max_len, 1, k)
    position = np.arange(max_len, dtype=np.float32)[:, None]
    div_term = np.exp(np.arange(0, k, 2, dtype=np.float32) * (-np.log(10000.0) / k))
    pe = np.zeros((max_len, k), np.float32)
    pe[:, 0::2] = np.sin(position * div_term)
    pe[:, 1::2] = np.cos(position * div_term)
    params["pe"] = jnp.asarray(pe[:, None, :])
    return params


# ---------------------------------------------------------------------------
if __name__ == "__main__":
    K, HEADS, DEPTH = 32, 4, 2
    B, T = 2, 8
    NUM_TOKENS, NUM_CLASSES = 50, 10

    key = jax.random.PRNGKey(0)
    pkey, tkey = jax.random.split(key)
    params = init_params(pkey, K, HEADS, DEPTH, NUM_TOKENS, NUM_CLASSES)
    tokens = jax.random.randint(tkey, (B, T), 0, NUM_TOKENS)

    prep = prepare_params(params)   # one-time weight prep (not on the forward path)

    fwd = jax.jit(functools.partial(transformer_forward, heads=HEADS, depth=DEPTH))
    out = jax.block_until_ready(fwd(tokens, prep))

    ref = reference_forward(tokens, params, HEADS, DEPTH)
    assert out.shape == (B, NUM_CLASSES)
    np.testing.assert_allclose(np.asarray(out), np.asarray(ref), rtol=2e-2, atol=2e-2)
    print("KERNEL_OK")
</pallas_src>

<mosaic_0001>
module attributes {stable_mosaic.version = 11 : i64} {
  func.func @fused_transformer_kernel(%arg0: i32, %arg1: memref<1x8x1xi32, #tpu.memory_space<vmem>>, %arg2: memref<50x32xf32, #tpu.memory_space<vmem>>, %arg3: memref<1x1x32xf32, #tpu.memory_space<vmem>>, %arg4: memref<2x32x384xbf16, #tpu.memory_space<vmem>>, %arg5: memref<2x128x32xbf16, #tpu.memory_space<vmem>>, %arg6: memref<2x32x64xbf16, #tpu.memory_space<vmem>>, %arg7: memref<2x64x32xbf16, #tpu.memory_space<vmem>>, %arg8: memref<2x8x64xf32, #tpu.memory_space<vmem>>, %arg9: memref<32x10xf32, #tpu.memory_space<vmem>>, %arg10: memref<1x10xf32, #tpu.memory_space<vmem>>, %arg11: memref<1x1x10xf32, #tpu.memory_space<vmem>>) attributes {dimension_semantics = [#tpu.dimension_semantics<parallel>], iteration_bounds = array<i64: 2>, scalar_prefetch = 0 : i64, scratch_operands = 0 : i64, tpu.core_type = #tpu.core_type<tc>, window_params = [{transform_indices = @transform_0, window_bounds = array<i64: 1, 8, 1>}, {pipeline_mode = #tpu.pipeline_mode<synchronous>, transform_indices = @transform_1, window_bounds = array<i64: 50, 32>}, {transform_indices = @transform_2, window_bounds = array<i64: 1, 1, 32>}, {pipeline_mode = #tpu.pipeline_mode<synchronous>, transform_indices = @transform_3, window_bounds = array<i64: 2, 32, 384>}, {pipeline_mode = #tpu.pipeline_mode<synchronous>, transform_indices = @transform_4, window_bounds = array<i64: 2, 128, 32>}, {pipeline_mode = #tpu.pipeline_mode<synchronous>, transform_indices = @transform_5, window_bounds = array<i64: 2, 32, 64>}, {pipeline_mode = #tpu.pipeline_mode<synchronous>, transform_indices = @transform_6, window_bounds = array<i64: 2, 64, 32>}, {pipeline_mode = #tpu.pipeline_mode<synchronous>, transform_indices = @transform_7, window_bounds = array<i64: 2, 8, 64>}, {pipeline_mode = #tpu.pipeline_mode<synchronous>, transform_indices = @transform_8, window_bounds = array<i64: 32, 10>}, {pipeline_mode = #tpu.pipeline_mode<synchronous>, transform_indices = @transform_9, window_bounds = array<i64: 1, 10>}, {transform_indices = @transform_10, window_bounds = array<i64: 1, 1, 10>}]} {
    %c0 = arith.constant 0 : index
    %c0_0 = arith.constant 0 : index
    %c0_1 = arith.constant 0 : index
    %0 = vector.load %arg1[%c0, %c0_0, %c0_1] : memref<1x8x1xi32, #tpu.memory_space<vmem>>, vector<1x8x1xi32>
    %1 = vector.shape_cast %0 : vector<1x8x1xi32> to vector<8x1xi32>
    %2 = tpu.iota {dimensions = array<i32: 1>} : vector<8x50xi32>
    %3 = vector.broadcast %1 : vector<8x1xi32> to vector<8x50xi32>
    %4 = arith.cmpi eq, %3, %2 : vector<8x50xi32>
    %5 = arith.extui %4 : vector<8x50xi1> to vector<8x50xi32>
    %6 = arith.sitofp %5 : vector<8x50xi32> to vector<8x50xf32>
    %c0_2 = arith.constant 0 : index
    %c0_3 = arith.constant 0 : index
    %7 = vector.load %arg2[%c0_2, %c0_3] : memref<50x32xf32, #tpu.memory_space<vmem>>, vector<50x32xf32>
    %cst = arith.constant dense<0.000000e+00> : vector<8x32xf32>
    %8 = tpu.matmul %6, %7, %cst {dimension_numbers = #tpu.dot_dimension_numbers<[1], [0], [0], [1], [0, 0, 1, 1], [], []>} : vector<8x50xf32>, vector<50x32xf32>, vector<8x32xf32> -> vector<8x32xf32>
    %cst_4 = arith.constant 5.65685415 : f32
    %9 = vector.broadcast %cst_4 : f32 to vector<8x32xf32>
    %10 = arith.mulf %8, %9 : vector<8x32xf32>
    %11 = vector.shape_cast %10 : vector<8x32xf32> to vector<1x8x32xf32>
    %c0_5 = arith.constant 0 : index
    %c0_6 = arith.constant 0 : index
    %c0_7 = arith.constant 0 : index
    %12 = vector.load %arg3[%c0_5, %c0_6, %c0_7] : memref<1x1x32xf32, #tpu.memory_space<vmem>>, vector<1x1x32xf32>
    %13 = vector.broadcast %12 : vector<1x1x32xf32> to vector<1x8x32xf32>
    %14 = arith.addf %11, %13 : vector<1x8x32xf32>
    %15 = vector.shape_cast %14 : vector<1x8x32xf32> to vector<8x32xf32>
    %c0_8 = arith.constant 0 : index
    %c0_9 = arith.constant 0 : index
    %c0_10 = arith.constant 0 : index
    %16 = vector.load %arg8[%c0_8, %c0_9, %c0_10] : memref<2x8x64xf32, #tpu.memory_space<vmem>>, vector<1x8x64xf32>
    %17 = vector.shape_cast %16 : vector<1x8x64xf32> to vector<8x64xf32>
    %18 = vector.extract_strided_slice %17 {offsets = [0, 0], sizes = [1, 32], strides = [1, 1]} : vector<8x64xf32> to vector<1x32xf32>
    %19 = vector.extract_strided_slice %17 {offsets = [1, 0], sizes = [1, 32], strides = [1, 1]} : vector<8x64xf32> to vector<1x32xf32>
    %20 = vector.extract_strided_slice %17 {offsets = [2, 0], sizes = [1, 32], strides = [1, 1]} : vector<8x64xf32> to vector<1x32xf32>
    %21 = vector.extract_strided_slice %17 {offsets = [3, 0], sizes = [1, 64], strides = [1, 1]} : vector<8x64xf32> to vector<1x64xf32>
    %22 = vector.extract_strided_slice %17 {offsets = [4, 0], sizes = [1, 32], strides = [1, 1]} : vector<8x64xf32> to vector<1x32xf32>
    %23 = vector.extract_strided_slice %17 {offsets = [5, 0], sizes = [1, 32], strides = [1, 1]} : vector<8x64xf32> to vector<1x32xf32>
    %24 = vector.extract_strided_slice %17 {offsets = [6, 0], sizes = [1, 32], strides = [1, 1]} : vector<8x64xf32> to vector<1x32xf32>
    %25 = arith.truncf %15 : vector<8x32xf32> to vector<8x32xbf16>
    %c0_11 = arith.constant 0 : index
    %c0_12 = arith.constant 0 : index
    %c0_13 = arith.constant 0 : index
    %26 = vector.load %arg4[%c0_11, %c0_12, %c0_13] : memref<2x32x384xbf16, #tpu.memory_space<vmem>>, vector<1x32x384xbf16>
    %27 = vector.shape_cast %26 : vector<1x32x384xbf16> to vector<32x384xbf16>
    %cst_14 = arith.constant dense<0.000000e+00> : vector<8x384xf32>
    %28 = tpu.matmul %25, %27, %cst_14 {dimension_numbers = #tpu.dot_dimension_numbers<[1], [0], [0], [1], [0, 0, 1, 1], [], []>} : vector<8x32xbf16>, vector<32x384xbf16>, vector<8x384xf32> -> vector<8x384xf32>
    %29 = vector.extract_strided_slice %28 {offsets = [0, 0], sizes = [8, 128], strides = [1, 1]} : vector<8x384xf32> to vector<8x128xf32>
    %30 = vector.extract_strided_slice %29 {offsets = [0, 0], sizes = [8, 32], strides = [1, 1]} : vector<8x128xf32> to vector<8x32xf32>
    %31 = vector.shape_cast %30 : vector<8x32xf32> to vector<1x8x32xf32>
    %32 = vector.extract_strided_slice %29 {offsets = [0, 32], sizes = [8, 32], strides = [1, 1]} : vector<8x128xf32> to vector<8x32xf32>
    %33 = vector.shape_cast %32 : vector<8x32xf32> to vector<1x8x32xf32>
    %34 = vector.extract_strided_slice %29 {offsets = [0, 64], sizes = [8, 32], strides = [1, 1]} : vector<8x128xf32> to vector<8x32xf32>
    %35 = vector.shape_cast %34 : vector<8x32xf32> to vector<1x8x32xf32>
    %36 = vector.extract_strided_slice %29 {offsets = [0, 96], sizes = [8, 32], strides = [1, 1]} : vector<8x128xf32> to vector<8x32xf32>
    %37 = vector.shape_cast %36 : vector<8x32xf32> to vector<1x8x32xf32>
    %38 = tpu.concatenate %31, %33, %35, %37 in 0 : vector<1x8x32xf32>, vector<1x8x32xf32>, vector<1x8x32xf32>, vector<1x8x32xf32> -> vector<4x8x32xf32>
    %39 = vector.extract_strided_slice %28 {offsets = [0, 128], sizes = [8, 128], strides = [1, 1]} : vector<8x384xf32> to vector<8x128xf32>
    %40 = vector.extract_strided_slice %39 {offsets = [0, 0], sizes = [8, 32], strides = [1, 1]} : vector<8x128xf32> to vector<8x32xf32>
    %41 = vector.shape_cast %40 : vector<8x32xf32> to vector<1x8x32xf32>
    %42 = vector.extract_strided_slice %39 {offsets = [0, 32], sizes = [8, 32], strides = [1, 1]} : vector<8x128xf32> to vector<8x32xf32>
    %43 = vector.shape_cast %42 : vector<8x32xf32> to vector<1x8x32xf32>
    %44 = vector.extract_strided_slice %39 {offsets = [0, 64], sizes = [8, 32], strides = [1, 1]} : vector<8x128xf32> to vector<8x32xf32>
    %45 = vector.shape_cast %44 : vector<8x32xf32> to vector<1x8x32xf32>
    %46 = vector.extract_strided_slice %39 {offsets = [0, 96], sizes = [8, 32], strides = [1, 1]} : vector<8x128xf32> to vector<8x32xf32>
    %47 = vector.shape_cast %46 : vector<8x32xf32> to vector<1x8x32xf32>
    %48 = tpu.concatenate %41, %43, %45, %47 in 0 : vector<1x8x32xf32>, vector<1x8x32xf32>, vector<1x8x32xf32>, vector<1x8x32xf32> -> vector<4x8x32xf32>
    %49 = vector.extract_strided_slice %28 {offsets = [0, 256], sizes = [8, 128], strides = [1, 1]} : vector<8x384xf32> to vector<8x128xf32>
    %50 = vector.extract_strided_slice %49 {offsets = [0, 0], sizes = [8, 32], strides = [1, 1]} : vector<8x128xf32> to vector<8x32xf32>
    %51 = vector.shape_cast %50 : vector<8x32xf32> to vector<1x8x32xf32>
    %52 = vector.extract_strided_slice %49 {offsets = [0, 32], sizes = [8, 32], strides = [1, 1]} : vector<8x128xf32> to vector<8x32xf32>
    %53 = vector.shape_cast %52 : vector<8x32xf32> to vector<1x8x32xf32>
    %54 = vector.extract_strided_slice %49 {offsets = [0, 64], sizes = [8, 32], strides = [1, 1]} : vector<8x128xf32> to vector<8x32xf32>
    %55 = vector.shape_cast %54 : vector<8x32xf32> to vector<1x8x32xf32>
    %56 = vector.extract_strided_slice %49 {offsets = [0, 96], sizes = [8, 32], strides = [1, 1]} : vector<8x128xf32> to vector<8x32xf32>
    %57 = vector.shape_cast %56 : vector<8x32xf32> to vector<1x8x32xf32>
    %58 = tpu.concatenate %51, %53, %55, %57 in 0 : vector<1x8x32xf32>, vector<1x8x32xf32>, vector<1x8x32xf32>, vector<1x8x32xf32> -> vector<4x8x32xf32>
    "tpu.trace_start"() <{level = 10 : i32, message = "xqd,xkd->xqk"}> : () -> ()
    %cst_15 = arith.constant dense<0.000000e+00> : vector<4x8x8xf32>
    %59 = tpu.matmul %38, %48, %cst_15 {dimension_numbers = #tpu.dot_dimension_numbers<[2], [2], [1], [1], [0, 0, 0, 1, 1, 1], [0], [0]>} : vector<4x8x32xf32>, vector<4x8x32xf32>, vector<4x8x8xf32> -> vector<4x8x8xf32>
    "tpu.trace_stop"() : () -> ()
    %cst_16 = arith.constant 0.176776692 : f32
    %60 = vector.broadcast %cst_16 : f32 to vector<4x8x8xf32>
    %61 = arith.mulf %59, %60 : vector<4x8x8xf32>
    %cst_17 = arith.constant dense<0xFF800000> : vector<4x8xf32>
    %62 = vector.multi_reduction <maximumf>, %61, %cst_17 [2] : vector<4x8x8xf32> to vector<4x8xf32>
    %63 = vector.shape_cast %62 : vector<4x8xf32> to vector<4x8x1xf32>
    %64 = vector.broadcast %63 : vector<4x8x1xf32> to vector<4x8x8xf32>
    %65 = arith.subf %61, %64 : vector<4x8x8xf32>
    %66 = math.exp %65 : vector<4x8x8xf32>
    %cst_18 = arith.constant dense<0.000000e+00> : vector<4x8xf32>
    %67 = vector.multi_reduction <add>, %66, %cst_18 [2] : vector<4x8x8xf32> to vector<4x8xf32>
    %68 = vector.shape_cast %67 : vector<4x8xf32> to vector<4x8x1xf32>
    %69 = vector.broadcast %68 : vector<4x8x1xf32> to vector<4x8x8xf32>
    %70 = arith.divf %66, %69 : vector<4x8x8xf32>
    "tpu.trace_start"() <{level = 10 : i32, message = "xqk,xkd->xqd"}> : () -> ()
    %cst_19 = arith.constant dense<0.000000e+00> : vector<4x8x32xf32>
    %71 = tpu.matmul %70, %58, %cst_19 {dimension_numbers = #tpu.dot_dimension_numbers<[2], [1], [1], [2], [0, 0, 0, 1, 1, 2], [0], [0]>} : vector<4x8x8xf32>, vector<4x8x32xf32>, vector<4x8x32xf32> -> vector<4x8x32xf32>
    "tpu.trace_stop"() : () -> ()
    %72 = vector.extract_strided_slice %71 {offsets = [0, 0, 0], sizes = [1, 8, 32], strides = [1, 1, 1]} : vector<4x8x32xf32> to vector<1x8x32xf32>
    %73 = vector.shape_cast %72 : vector<1x8x32xf32> to vector<8x32xf32>
    %74 = vector.extract_strided_slice %71 {offsets = [1, 0, 0], sizes = [1, 8, 32], strides = [1, 1, 1]} : vector<4x8x32xf32> to vector<1x8x32xf32>
    %75 = vector.shape_cast %74 : vector<1x8x32xf32> to vector<8x32xf32>
    %76 = vector.extract_strided_slice %71 {offsets = [2, 0, 0], sizes = [1, 8, 32], strides = [1, 1, 1]} : vector<4x8x32xf32> to vector<1x8x32xf32>
    %77 = vector.shape_cast %76 : vector<1x8x32xf32> to vector<8x32xf32>
    %78 = vector.extract_strided_slice %71 {offsets = [3, 0, 0], sizes = [1, 8, 32], strides = [1, 1, 1]} : vector<4x8x32xf32> to vector<1x8x32xf32>
    %79 = vector.shape_cast %78 : vector<1x8x32xf32> to vector<8x32xf32>
    %80 = tpu.concatenate %73, %75, %77, %79 in 1 : vector<8x32xf32>, vector<8x32xf32>, vector<8x32xf32>, vector<8x32xf32> -> vector<8x128xf32>
    %81 = arith.truncf %80 : vector<8x128xf32> to vector<8x128xbf16>
    %c0_20 = arith.constant 0 : index
    %c0_21 = arith.constant 0 : index
    %c0_22 = arith.constant 0 : index
    %82 = vector.load %arg5[%c0_20, %c0_21, %c0_22] : memref<2x128x32xbf16, #tpu.memory_space<vmem>>, vector<1x128x32xbf16>
    %83 = vector.shape_cast %82 : vector<1x128x32xbf16> to vector<128x32xbf16>
    %cst_23 = arith.constant dense<0.000000e+00> : vector<8x32xf32>
    %84 = tpu.matmul %81, %83, %cst_23 {dimension_numbers = #tpu.dot_dimension_numbers<[1], [0], [0], [1], [0, 0, 1, 1], [], []>} : vector<8x128xbf16>, vector<128x32xbf16>, vector<8x32xf32> -> vector<8x32xf32>
    %85 = vector.broadcast %18 : vector<1x32xf32> to vector<8x32xf32>
    %86 = arith.addf %84, %85 : vector<8x32xf32>
    %87 = arith.addf %86, %15 : vector<8x32xf32>
    %cst_24 = arith.constant dense<0.000000e+00> : vector<8xf32>
    %88 = vector.multi_reduction <add>, %87, %cst_24 [1] : vector<8x32xf32> to vector<8xf32>
    %89 = vector.shape_cast %88 : vector<8xf32> to vector<8x1xf32>
    %cst_25 = arith.constant 3.200000e+01 : f32
    %90 = vector.broadcast %cst_25 : f32 to vector<8x1xf32>
    %91 = arith.divf %89, %90 : vector<8x1xf32>
    %92 = vector.broadcast %91 : vector<8x1xf32> to vector<8x32xf32>
    %93 = arith.subf %87, %92 : vector<8x32xf32>
    %94 = arith.mulf %93, %93 : vector<8x32xf32>
    %cst_26 = arith.constant dense<0.000000e+00> : vector<8xf32>
    %95 = vector.multi_reduction <add>, %94, %cst_26 [1] : vector<8x32xf32> to vector<8xf32>
    %96 = vector.shape_cast %95 : vector<8xf32> to vector<8x1xf32>
    %cst_27 = arith.constant 3.200000e+01 : f32
    %97 = vector.broadcast %cst_27 : f32 to vector<8x1xf32>
    %98 = arith.divf %96, %97 : vector<8x1xf32>
    %99 = vector.broadcast %91 : vector<8x1xf32> to vector<8x32xf32>
    %100 = arith.subf %87, %99 : vector<8x32xf32>
    %cst_28 = arith.constant 9.99999974E-6 : f32
    %101 = vector.broadcast %cst_28 : f32 to vector<8x1xf32>
    %102 = arith.addf %98, %101 : vector<8x1xf32>
    %103 = math.rsqrt %102 : vector<8x1xf32>
    %104 = vector.broadcast %103 : vector<8x1xf32> to vector<8x32xf32>
    %105 = arith.mulf %100, %104 : vector<8x32xf32>
    %106 = vector.broadcast %19 : vector<1x32xf32> to vector<8x32xf32>
    %107 = arith.mulf %105, %106 : vector<8x32xf32>
    %108 = vector.broadcast %20 : vector<1x32xf32> to vector<8x32xf32>
    %109 = arith.addf %107, %108 : vector<8x32xf32>
    %110 = arith.truncf %109 : vector<8x32xf32> to vector<8x32xbf16>
    %c0_29 = arith.constant 0 : index
    %c0_30 = arith.constant 0 : index
    %c0_31 = arith.constant 0 : index
    %111 = vector.load %arg6[%c0_29, %c0_30, %c0_31] : memref<2x32x64xbf16, #tpu.memory_space<vmem>>, vector<1x32x64xbf16>
    %112 = vector.shape_cast %111 : vector<1x32x64xbf16> to vector<32x64xbf16>
    %cst_32 = arith.constant dense<0.000000e+00> : vector<8x64xf32>
    %113 = tpu.matmul %110, %112, %cst_32 {dimension_numbers = #tpu.dot_dimension_numbers<[1], [0], [0], [1], [0, 0, 1, 1], [], []>} : vector<8x32xbf16>, vector<32x64xbf16>, vector<8x64xf32> -> vector<8x64xf32>
    %114 = vector.broadcast %21 : vector<1x64xf32> to vector<8x64xf32>
    %115 = arith.addf %113, %114 : vector<8x64xf32>
    %cst_33 = arith.constant 0.000000e+00 : f32
    %116 = vector.broadcast %cst_33 : f32 to vector<8x64xf32>
    %117 = arith.maximumf %115, %116 : vector<8x64xf32>
    %118 = arith.truncf %117 : vector<8x64xf32> to vector<8x64xbf16>
    %c0_34 = arith.constant 0 : index
    %c0_35 = arith.constant 0 : index
    %c0_36 = arith.constant 0 : index
    %119 = vector.load %arg7[%c0_34, %c0_35, %c0_36] : memref<2x64x32xbf16, #tpu.memory_space<vmem>>, vector<1x64x32xbf16>
    %120 = vector.shape_cast %119 : vector<1x64x32xbf16> to vector<64x32xbf16>
    %cst_37 = arith.constant dense<0.000000e+00> : vector<8x32xf32>
    %121 = tpu.matmul %118, %120, %cst_37 {dimension_numbers = #tpu.dot_dimension_numbers<[1], [0], [0], [1], [0, 0, 1, 1], [], []>} : vector<8x64xbf16>, vector<64x32xbf16>, vector<8x32xf32> -> vector<8x32xf32>
    %122 = vector.broadcast %22 : vector<1x32xf32> to vector<8x32xf32>
    %123 = arith.addf %121, %122 : vector<8x32xf32>
    %124 = arith.addf %123, %109 : vector<8x32xf32>
    %cst_38 = arith.constant dense<0.000000e+00> : vector<8xf32>
    %125 = vector.multi_reduction <add>, %124, %cst_38 [1] : vector<8x32xf32> to vector<8xf32>
    %126 = vector.shape_cast %125 : vector<8xf32> to vector<8x1xf32>
    %cst_39 = arith.constant 3.200000e+01 : f32
    %127 = vector.broadcast %cst_39 : f32 to vector<8x1xf32>
    %128 = arith.divf %126, %127 : vector<8x1xf32>
    %129 = vector.broadcast %128 : vector<8x1xf32> to vector<8x32xf32>
    %130 = arith.subf %124, %129 : vector<8x32xf32>
    %131 = arith.mulf %130, %130 : vector<8x32xf32>
    %cst_40 = arith.constant dense<0.000000e+00> : vector<8xf32>
    %132 = vector.multi_reduction <add>, %131, %cst_40 [1] : vector<8x32xf32> to vector<8xf32>
    %133 = vector.shape_cast %132 : vector<8xf32> to vector<8x1xf32>
    %cst_41 = arith.constant 3.200000e+01 : f32
    %134 = vector.broadcast %cst_41 : f32 to vector<8x1xf32>
    %135 = arith.divf %133, %134 : vector<8x1xf32>
    %136 = vector.broadcast %128 : vector<8x1xf32> to vector<8x32xf32>
    %137 = arith.subf %124, %136 : vector<8x32xf32>
    %cst_42 = arith.constant 9.99999974E-6 : f32
    %138 = vector.broadcast %cst_42 : f32 to vector<8x1xf32>
    %139 = arith.addf %135, %138 : vector<8x1xf32>
    %140 = math.rsqrt %139 : vector<8x1xf32>
    %141 = vector.broadcast %140 : vector<8x1xf32> to vector<8x32xf32>
    %142 = arith.mulf %137, %141 : vector<8x32xf32>
    %143 = vector.broadcast %23 : vector<1x32xf32> to vector<8x32xf32>
    %144 = arith.mulf %142, %143 : vector<8x32xf32>
    %145 = vector.broadcast %24 : vector<1x32xf32> to vector<8x32xf32>
    %146 = arith.addf %144, %145 : vector<8x32xf32>
    %c1 = arith.constant 1 : index
    %c0_43 = arith.constant 0 : index
    %c0_44 = arith.constant 0 : index
    %147 = vector.load %arg8[%c1, %c0_43, %c0_44] : memref<2x8x64xf32, #tpu.memory_space<vmem>>, vector<1x8x64xf32>
    %148 = vector.shape_cast %147 : vector<1x8x64xf32> to vector<8x64xf32>
    %149 = vector.extract_strided_slice %148 {offsets = [0, 0], sizes = [1, 32], strides = [1, 1]} : vector<8x64xf32> to vector<1x32xf32>
    %150 = vector.extract_strided_slice %148 {offsets = [1, 0], sizes = [1, 32], strides = [1, 1]} : vector<8x64xf32> to vector<1x32xf32>
    %151 = vector.extract_strided_slice %148 {offsets = [2, 0], sizes = [1, 32], strides = [1, 1]} : vector<8x64xf32> to vector<1x32xf32>
    %152 = vector.extract_strided_slice %148 {offsets = [3, 0], sizes = [1, 64], strides = [1, 1]} : vector<8x64xf32> to vector<1x64xf32>
    %153 = vector.extract_strided_slice %148 {offsets = [4, 0], sizes = [1, 32], strides = [1, 1]} : vector<8x64xf32> to vector<1x32xf32>
    %154 = vector.extract_strided_slice %148 {offsets = [5, 0], sizes = [1, 32], strides = [1, 1]} : vector<8x64xf32> to vector<1x32xf32>
    %155 = vector.extract_strided_slice %148 {offsets = [6, 0], sizes = [1, 32], strides = [1, 1]} : vector<8x64xf32> to vector<1x32xf32>
    %156 = arith.truncf %146 : vector<8x32xf32> to vector<8x32xbf16>
    %c1_45 = arith.constant 1 : index
    %c0_46 = arith.constant 0 : index
    %c0_47 = arith.constant 0 : index
    %157 = vector.load %arg4[%c1_45, %c0_46, %c0_47] : memref<2x32x384xbf16, #tpu.memory_space<vmem>>, vector<1x32x384xbf16>
    %158 = vector.shape_cast %157 : vector<1x32x384xbf16> to vector<32x384xbf16>
    %cst_48 = arith.constant dense<0.000000e+00> : vector<8x384xf32>
    %159 = tpu.matmul %156, %158, %cst_48 {dimension_numbers = #tpu.dot_dimension_numbers<[1], [0], [0], [1], [0, 0, 1, 1], [], []>} : vector<8x32xbf16>, vector<32x384xbf16>, vector<8x384xf32> -> vector<8x384xf32>
    %160 = vector.extract_strided_slice %159 {offsets = [0, 0], sizes = [8, 128], strides = [1, 1]} : vector<8x384xf32> to vector<8x128xf32>
    %161 = vector.extract_strided_slice %160 {offsets = [0, 0], sizes = [8, 32], strides = [1, 1]} : vector<8x128xf32> to vector<8x32xf32>
    %162 = vector.shape_cast %161 : vector<8x32xf32> to vector<1x8x32xf32>
    %163 = vector.extract_strided_slice %160 {offsets = [0, 32], sizes = [8, 32], strides = [1, 1]} : vector<8x128xf32> to vector<8x32xf32>
    %164 = vector.shape_cast %163 : vector<8x32xf32> to vector<1x8x32xf32>
    %165 = vector.extract_strided_slice %160 {offsets = [0, 64], sizes = [8, 32], strides = [1, 1]} : vector<8x128xf32> to vector<8x32xf32>
    %166 = vector.shape_cast %165 : vector<8x32xf32> to vector<1x8x32xf32>
    %167 = vector.extract_strided_slice %160 {offsets = [0, 96], sizes = [8, 32], strides = [1, 1]} : vector<8x128xf32> to vector<8x32xf32>
    %168 = vector.shape_cast %167 : vector<8x32xf32> to vector<1x8x32xf32>
    %169 = tpu.concatenate %162, %164, %166, %168 in 0 : vector<1x8x32xf32>, vector<1x8x32xf32>, vector<1x8x32xf32>, vector<1x8x32xf32> -> vector<4x8x32xf32>
    %170 = vector.extract_strided_slice %159 {offsets = [0, 128], sizes = [8, 128], strides = [1, 1]} : vector<8x384xf32> to vector<8x128xf32>
    %171 = vector.extract_strided_slice %170 {offsets = [0, 0], sizes = [8, 32], strides = [1, 1]} : vector<8x128xf32> to vector<8x32xf32>
    %172 = vector.shape_cast %171 : vector<8x32xf32> to vector<1x8x32xf32>
    %173 = vector.extract_strided_slice %170 {offsets = [0, 32], sizes = [8, 32], strides = [1, 1]} : vector<8x128xf32> to vector<8x32xf32>
    %174 = vector.shape_cast %173 : vector<8x32xf32> to vector<1x8x32xf32>
    %175 = vector.extract_strided_slice %170 {offsets = [0, 64], sizes = [8, 32], strides = [1, 1]} : vector<8x128xf32> to vector<8x32xf32>
    %176 = vector.shape_cast %175 : vector<8x32xf32> to vector<1x8x32xf32>
    %177 = vector.extract_strided_slice %170 {offsets = [0, 96], sizes = [8, 32], strides = [1, 1]} : vector<8x128xf32> to vector<8x32xf32>
    %178 = vector.shape_cast %177 : vector<8x32xf32> to vector<1x8x32xf32>
    %179 = tpu.concatenate %172, %174, %176, %178 in 0 : vector<1x8x32xf32>, vector<1x8x32xf32>, vector<1x8x32xf32>, vector<1x8x32xf32> -> vector<4x8x32xf32>
    %180 = vector.extract_strided_slice %159 {offsets = [0, 256], sizes = [8, 128], strides = [1, 1]} : vector<8x384xf32> to vector<8x128xf32>
    %181 = vector.extract_strided_slice %180 {offsets = [0, 0], sizes = [8, 32], strides = [1, 1]} : vector<8x128xf32> to vector<8x32xf32>
    %182 = vector.shape_cast %181 : vector<8x32xf32> to vector<1x8x32xf32>
    %183 = vector.extract_strided_slice %180 {offsets = [0, 32], sizes = [8, 32], strides = [1, 1]} : vector<8x128xf32> to vector<8x32xf32>
    %184 = vector.shape_cast %183 : vector<8x32xf32> to vector<1x8x32xf32>
    %185 = vector.extract_strided_slice %180 {offsets = [0, 64], sizes = [8, 32], strides = [1, 1]} : vector<8x128xf32> to vector<8x32xf32>
    %186 = vector.shape_cast %185 : vector<8x32xf32> to vector<1x8x32xf32>
    %187 = vector.extract_strided_slice %180 {offsets = [0, 96], sizes = [8, 32], strides = [1, 1]} : vector<8x128xf32> to vector<8x32xf32>
    %188 = vector.shape_cast %187 : vector<8x32xf32> to vector<1x8x32xf32>
    %189 = tpu.concatenate %182, %184, %186, %188 in 0 : vector<1x8x32xf32>, vector<1x8x32xf32>, vector<1x8x32xf32>, vector<1x8x32xf32> -> vector<4x8x32xf32>
    "tpu.trace_start"() <{level = 10 : i32, message = "xqd,xkd->xqk"}> : () -> ()
    %cst_49 = arith.constant dense<0.000000e+00> : vector<4x8x8xf32>
    %190 = tpu.matmul %169, %179, %cst_49 {dimension_numbers = #tpu.dot_dimension_numbers<[2], [2], [1], [1], [0, 0, 0, 1, 1, 1], [0], [0]>} : vector<4x8x32xf32>, vector<4x8x32xf32>, vector<4x8x8xf32> -> vector<4x8x8xf32>
    "tpu.trace_stop"() : () -> ()
    %cst_50 = arith.constant 0.176776692 : f32
    %191 = vector.broadcast %cst_50 : f32 to vector<4x8x8xf32>
    %192 = arith.mulf %190, %191 : vector<4x8x8xf32>
    %cst_51 = arith.constant dense<0xFF800000> : vector<4x8xf32>
    %193 = vector.multi_reduction <maximumf>, %192, %cst_51 [2] : vector<4x8x8xf32> to vector<4x8xf32>
    %194 = vector.shape_cast %193 : vector<4x8xf32> to vector<4x8x1xf32>
    %195 = vector.broadcast %194 : vector<4x8x1xf32> to vector<4x8x8xf32>
    %196 = arith.subf %192, %195 : vector<4x8x8xf32>
    %197 = math.exp %196 : vector<4x8x8xf32>
    %cst_52 = arith.constant dense<0.000000e+00> : vector<4x8xf32>
    %198 = vector.multi_reduction <add>, %197, %cst_52 [2] : vector<4x8x8xf32> to vector<4x8xf32>
    %199 = vector.shape_cast %198 : vector<4x8xf32> to vector<4x8x1xf32>
    %200 = vector.broadcast %199 : vector<4x8x1xf32> to vector<4x8x8xf32>
    %201 = arith.divf %197, %200 : vector<4x8x8xf32>
    "tpu.trace_start"() <{level = 10 : i32, message = "xqk,xkd->xqd"}> : () -> ()
    %cst_53 = arith.constant dense<0.000000e+00> : vector<4x8x32xf32>
    %202 = tpu.matmul %201, %189, %cst_53 {dimension_numbers = #tpu.dot_dimension_numbers<[2], [1], [1], [2], [0, 0, 0, 1, 1, 2], [0], [0]>} : vector<4x8x8xf32>, vector<4x8x32xf32>, vector<4x8x32xf32> -> vector<4x8x32xf32>
    "tpu.trace_stop"() : () -> ()
    %203 = vector.extract_strided_slice %202 {offsets = [0, 0, 0], sizes = [1, 8, 32], strides = [1, 1, 1]} : vector<4x8x32xf32> to vector<1x8x32xf32>
    %204 = vector.shape_cast %203 : vector<1x8x32xf32> to vector<8x32xf32>
    %205 = vector.extract_strided_slice %202 {offsets = [1, 0, 0], sizes = [1, 8, 32], strides = [1, 1, 1]} : vector<4x8x32xf32> to vector<1x8x32xf32>
    %206 = vector.shape_cast %205 : vector<1x8x32xf32> to vector<8x32xf32>
    %207 = vector.extract_strided_slice %202 {offsets = [2, 0, 0], sizes = [1, 8, 32], strides = [1, 1, 1]} : vector<4x8x32xf32> to vector<1x8x32xf32>
    %208 = vector.shape_cast %207 : vector<1x8x32xf32> to vector<8x32xf32>
    %209 = vector.extract_strided_slice %202 {offsets = [3, 0, 0], sizes = [1, 8, 32], strides = [1, 1, 1]} : vector<4x8x32xf32> to vector<1x8x32xf32>
    %210 = vector.shape_cast %209 : vector<1x8x32xf32> to vector<8x32xf32>
    %211 = tpu.concatenate %204, %206, %208, %210 in 1 : vector<8x32xf32>, vector<8x32xf32>, vector<8x32xf32>, vector<8x32xf32> -> vector<8x128xf32>
    %212 = arith.truncf %211 : vector<8x128xf32> to vector<8x128xbf16>
    %c1_54 = arith.constant 1 : index
    %c0_55 = arith.constant 0 : index
    %c0_56 = arith.constant 0 : index
    %213 = vector.load %arg5[%c1_54, %c0_55, %c0_56] : memref<2x128x32xbf16, #tpu.memory_space<vmem>>, vector<1x128x32xbf16>
    %214 = vector.shape_cast %213 : vector<1x128x32xbf16> to vector<128x32xbf16>
    %cst_57 = arith.constant dense<0.000000e+00> : vector<8x32xf32>
    %215 = tpu.matmul %212, %214, %cst_57 {dimension_numbers = #tpu.dot_dimension_numbers<[1], [0], [0], [1], [0, 0, 1, 1], [], []>} : vector<8x128xbf16>, vector<128x32xbf16>, vector<8x32xf32> -> vector<8x32xf32>
    %216 = vector.broadcast %149 : vector<1x32xf32> to vector<8x32xf32>
    %217 = arith.addf %215, %216 : vector<8x32xf32>
    %218 = arith.addf %217, %146 : vector<8x32xf32>
    %cst_58 = arith.constant dense<0.000000e+00> : vector<8xf32>
    %219 = vector.multi_reduction <add>, %218, %cst_58 [1] : vector<8x32xf32> to vector<8xf32>
    %220 = vector.shape_cast %219 : vector<8xf32> to vector<8x1xf32>
    %cst_59 = arith.constant 3.200000e+01 : f32
    %221 = vector.broadcast %cst_59 : f32 to vector<8x1xf32>
    %222 = arith.divf %220, %221 : vector<8x1xf32>
    %223 = vector.broadcast %222 : vector<8x1xf32> to vector<8x32xf32>
    %224 = arith.subf %218, %223 : vector<8x32xf32>
    %225 = arith.mulf %224, %224 : vector<8x32xf32>
    %cst_60 = arith.constant dense<0.000000e+00> : vector<8xf32>
    %226 = vector.multi_reduction <add>, %225, %cst_60 [1] : vector<8x32xf32> to vector<8xf32>
    %227 = vector.shape_cast %226 : vector<8xf32> to vector<8x1xf32>
    %cst_61 = arith.constant 3.200000e+01 : f32
    %228 = vector.broadcast %cst_61 : f32 to vector<8x1xf32>
    %229 = arith.divf %227, %228 : vector<8x1xf32>
    %230 = vector.broadcast %222 : vector<8x1xf32> to vector<8x32xf32>
    %231 = arith.subf %218, %230 : vector<8x32xf32>
    %cst_62 = arith.constant 9.99999974E-6 : f32
    %232 = vector.broadcast %cst_62 : f32 to vector<8x1xf32>
    %233 = arith.addf %229, %232 : vector<8x1xf32>
    %234 = math.rsqrt %233 : vector<8x1xf32>
    %235 = vector.broadcast %234 : vector<8x1xf32> to vector<8x32xf32>
    %236 = arith.mulf %231, %235 : vector<8x32xf32>
    %237 = vector.broadcast %150 : vector<1x32xf32> to vector<8x32xf32>
    %238 = arith.mulf %236, %237 : vector<8x32xf32>
    %239 = vector.broadcast %151 : vector<1x32xf32> to vector<8x32xf32>
    %240 = arith.addf %238, %239 : vector<8x32xf32>
    %241 = arith.truncf %240 : vector<8x32xf32> to vector<8x32xbf16>
    %c1_63 = arith.constant 1 : index
    %c0_64 = arith.constant 0 : index
    %c0_65 = arith.constant 0 : index
    %242 = vector.load %arg6[%c1_63, %c0_64, %c0_65] : memref<2x32x64xbf16, #tpu.memory_space<vmem>>, vector<1x32x64xbf16>
    %243 = vector.shape_cast %242 : vector<1x32x64xbf16> to vector<32x64xbf16>
    %cst_66 = arith.constant dense<0.000000e+00> : vector<8x64xf32>
    %244 = tpu.matmul %241, %243, %cst_66 {dimension_numbers = #tpu.dot_dimension_numbers<[1], [0], [0], [1], [0, 0, 1, 1], [], []>} : vector<8x32xbf16>, vector<32x64xbf16>, vector<8x64xf32> -> vector<8x64xf32>
    %245 = vector.broadcast %152 : vector<1x64xf32> to vector<8x64xf32>
    %246 = arith.addf %244, %245 : vector<8x64xf32>
    %cst_67 = arith.constant 0.000000e+00 : f32
    %247 = vector.broadcast %cst_67 : f32 to vector<8x64xf32>
    %248 = arith.maximumf %246, %247 : vector<8x64xf32>
    %249 = arith.truncf %248 : vector<8x64xf32> to vector<8x64xbf16>
    %c1_68 = arith.constant 1 : index
    %c0_69 = arith.constant 0 : index
    %c0_70 = arith.constant 0 : index
    %250 = vector.load %arg7[%c1_68, %c0_69, %c0_70] : memref<2x64x32xbf16, #tpu.memory_space<vmem>>, vector<1x64x32xbf16>
    %251 = vector.shape_cast %250 : vector<1x64x32xbf16> to vector<64x32xbf16>
    %cst_71 = arith.constant dense<0.000000e+00> : vector<8x32xf32>
    %252 = tpu.matmul %249, %251, %cst_71 {dimension_numbers = #tpu.dot_dimension_numbers<[1], [0], [0], [1], [0, 0, 1, 1], [], []>} : vector<8x64xbf16>, vector<64x32xbf16>, vector<8x32xf32> -> vector<8x32xf32>
    %253 = vector.broadcast %153 : vector<1x32xf32> to vector<8x32xf32>
    %254 = arith.addf %252, %253 : vector<8x32xf32>
    %255 = arith.addf %254, %240 : vector<8x32xf32>
    %cst_72 = arith.constant dense<0.000000e+00> : vector<8xf32>
    %256 = vector.multi_reduction <add>, %255, %cst_72 [1] : vector<8x32xf32> to vector<8xf32>
    %257 = vector.shape_cast %256 : vector<8xf32> to vector<8x1xf32>
    %cst_73 = arith.constant 3.200000e+01 : f32
    %258 = vector.broadcast %cst_73 : f32 to vector<8x1xf32>
    %259 = arith.divf %257, %258 : vector<8x1xf32>
    %260 = vector.broadcast %259 : vector<8x1xf32> to vector<8x32xf32>
    %261 = arith.subf %255, %260 : vector<8x32xf32>
    %262 = arith.mulf %261, %261 : vector<8x32xf32>
    %cst_74 = arith.constant dense<0.000000e+00> : vector<8xf32>
    %263 = vector.multi_reduction <add>, %262, %cst_74 [1] : vector<8x32xf32> to vector<8xf32>
    %264 = vector.shape_cast %263 : vector<8xf32> to vector<8x1xf32>
    %cst_75 = arith.constant 3.200000e+01 : f32
    %265 = vector.broadcast %cst_75 : f32 to vector<8x1xf32>
    %266 = arith.divf %264, %265 : vector<8x1xf32>
    %267 = vector.broadcast %259 : vector<8x1xf32> to vector<8x32xf32>
    %268 = arith.subf %255, %267 : vector<8x32xf32>
    %cst_76 = arith.constant 9.99999974E-6 : f32
    %269 = vector.broadcast %cst_76 : f32 to vector<8x1xf32>
    %270 = arith.addf %266, %269 : vector<8x1xf32>
    %271 = math.rsqrt %270 : vector<8x1xf32>
    %272 = vector.broadcast %271 : vector<8x1xf32> to vector<8x32xf32>
    %273 = arith.mulf %268, %272 : vector<8x32xf32>
    %274 = vector.broadcast %154 : vector<1x32xf32> to vector<8x32xf32>
    %275 = arith.mulf %273, %274 : vector<8x32xf32>
    %276 = vector.broadcast %155 : vector<1x32xf32> to vector<8x32xf32>
    %277 = arith.addf %275, %276 : vector<8x32xf32>
    %278 = vector.shape_cast %277 : vector<8x32xf32> to vector<1x8x32xf32>
    %cst_77 = arith.constant dense<0.000000e+00> : vector<1x32xf32>
    %279 = vector.multi_reduction <add>, %278, %cst_77 [1] : vector<1x8x32xf32> to vector<1x32xf32>
    %cst_78 = arith.constant 8.000000e+00 : f32
    %280 = vector.broadcast %cst_78 : f32 to vector<1x32xf32>
    %281 = arith.divf %279, %280 : vector<1x32xf32>
    %c0_79 = arith.constant 0 : index
    %c0_80 = arith.constant 0 : index
    %282 = vector.load %arg9[%c0_79, %c0_80] : memref<32x10xf32, #tpu.memory_space<vmem>>, vector<32x10xf32>
    %cst_81 = arith.constant dense<0.000000e+00> : vector<1x10xf32>
    %283 = tpu.matmul %281, %282, %cst_81 {dimension_numbers = #tpu.dot_dimension_numbers<[1], [0], [0], [1], [0, 0, 1, 1], [], []>} : vector<1x32xf32>, vector<32x10xf32>, vector<1x10xf32> -> vector<1x10xf32>
    %c0_82 = arith.constant 0 : index
    %c0_83 = arith.constant 0 : index
    %284 = vector.load %arg10[%c0_82, %c0_83] : memref<1x10xf32, #tpu.memory_space<vmem>>, vector<1x10xf32>
    %285 = arith.addf %283, %284 : vector<1x10xf32>
    %cst_84 = arith.constant dense<0xFF800000> : vector<1xf32>
    %286 = vector.multi_reduction <maximumf>, %285, %cst_84 [1] : vector<1x10xf32> to vector<1xf32>
    %287 = vector.shape_cast %286 : vector<1xf32> to vector<1x1xf32>
    %288 = vector.broadcast %287 : vector<1x1xf32> to vector<1x10xf32>
    %289 = arith.subf %285, %288 : vector<1x10xf32>
    %290 = math.exp %289 : vector<1x10xf32>
    %cst_85 = arith.constant dense<0.000000e+00> : vector<1xf32>
    %291 = vector.multi_reduction <add>, %290, %cst_85 [1] : vector<1x10xf32> to vector<1xf32>
    %292 = vector.shape_cast %291 : vector<1xf32> to vector<1x1xf32>
    %293 = math.log %292 : vector<1x1xf32>
    %294 = vector.broadcast %293 : vector<1x1xf32> to vector<1x10xf32>
    %295 = arith.subf %289, %294 : vector<1x10xf32>
    %296 = vector.shape_cast %295 : vector<1x10xf32> to vector<1x1x10xf32>
    %c0_86 = arith.constant 0 : index
    %c0_87 = arith.constant 0 : index
    %c0_88 = arith.constant 0 : index
    %297 = vector.load %arg11[%c0_86, %c0_87, %c0_88] : memref<1x1x10xf32, #tpu.memory_space<vmem>>, vector<1x1x10xf32>
    tpu.vector_store %arg11[%c0_86, %c0_87, %c0_88], %296 {strides = array<i32>} : memref<1x1x10xf32, #tpu.memory_space<vmem>>, vector<1x1x10xf32>,
    return
  }
  func.func @transform_0(%arg0: i32) -> (i32, i32, i32) {
    %c0_i32 = arith.constant 0 : i32
    %c0_i32_0 = arith.constant 0 : i32
    %c0_i32_1 = arith.constant 0 : i32
    return %arg0, %c0_i32, %c0_i32_0 : i32, i32, i32
  }
  func.func @transform_1(%arg0: i32) -> (i32, i32) {
    %c0_i32 = arith.constant 0 : i32
    %c0_i32_0 = arith.constant 0 : i32
    %c0_i32_1 = arith.constant 0 : i32
    return %c0_i32, %c0_i32_0 : i32, i32
  }
  func.func @transform_2(%arg0: i32) -> (i32, i32, i32) {
    %c0_i32 = arith.constant 0 : i32
    %c0_i32_0 = arith.constant 0 : i32
    %c0_i32_1 = arith.constant 0 : i32
    return %arg0, %c0_i32, %c0_i32_0 : i32, i32, i32
  }
  func.func @transform_3(%arg0: i32) -> (i32, i32, i32) {
    %c0_i32 = arith.constant 0 : i32
    %c0_i32_0 = arith.constant 0 : i32
    %c0_i32_1 = arith.constant 0 : i32
    %c0_i32_2 = arith.constant 0 : i32
    return %c0_i32, %c0_i32_0, %c0_i32_1 : i32, i32, i32
  }
  func.func @transform_4(%arg0: i32) -> (i32, i32, i32) {
    %c0_i32 = arith.constant 0 : i32
    %c0_i32_0 = arith.constant 0 : i32
    %c0_i32_1 = arith.constant 0 : i32
    %c0_i32_2 = arith.constant 0 : i32
    return %c0_i32, %c0_i32_0, %c0_i32_1 : i32, i32, i32
  }
  func.func @transform_5(%arg0: i32) -> (i32, i32, i32) {
    %c0_i32 = arith.constant 0 : i32
    %c0_i32_0 = arith.constant 0 : i32
    %c0_i32_1 = arith.constant 0 : i32
    %c0_i32_2 = arith.constant 0 : i32
    return %c0_i32, %c0_i32_0, %c0_i32_1 : i32, i32, i32
  }
  func.func @transform_6(%arg0: i32) -> (i32, i32, i32) {
    %c0_i32 = arith.constant 0 : i32
    %c0_i32_0 = arith.constant 0 : i32
    %c0_i32_1 = arith.constant 0 : i32
    %c0_i32_2 = arith.constant 0 : i32
    return %c0_i32, %c0_i32_0, %c0_i32_1 : i32, i32, i32
  }
  func.func @transform_7(%arg0: i32) -> (i32, i32, i32) {
    %c0_i32 = arith.constant 0 : i32
    %c0_i32_0 = arith.constant 0 : i32
    %c0_i32_1 = arith.constant 0 : i32
    %c0_i32_2 = arith.constant 0 : i32
    return %c0_i32, %c0_i32_0, %c0_i32_1 : i32, i32, i32
  }
  func.func @transform_8(%arg0: i32) -> (i32, i32) {
    %c0_i32 = arith.constant 0 : i32
    %c0_i32_0 = arith.constant 0 : i32
    %c0_i32_1 = arith.constant 0 : i32
    return %c0_i32, %c0_i32_0 : i32, i32
  }
  func.func @transform_9(%arg0: i32) -> (i32, i32) {
    %c0_i32 = arith.constant 0 : i32
    %c0_i32_0 = arith.constant 0 : i32
    %c0_i32_1 = arith.constant 0 : i32
    return %c0_i32, %c0_i32_0 : i32, i32
  }
  func.func @transform_10(%arg0: i32) -> (i32, i32, i32) {
    %c0_i32 = arith.constant 0 : i32
    %c0_i32_0 = arith.constant 0 : i32
    %c0_i32_1 = arith.constant 0 : i32
    return %arg0, %c0_i32, %c0_i32_0 : i32, i32, i32
  }
}

</mosaic_0001>

<bundles_post_ra>
// kernel: transformer_forward.1
= control target key start
LH: loop header
LB: loop body
LE: loop exit
PB: predicated region body
PF: predicated region fallthrough
CT: control target
= control target key end

     0   :  { %15 = vsyncpa [#allocation3], 0  ;;  %s4101_s0 = inlined_call_operand.vmem [shape: s32[2,8,1], index: 0, kind: input, shape index: {}]   ;;  %s4102_s1 = inlined_call_operand.vmem [shape: f32[50,32], index: 1, kind: input, shape index: {}]   ;;  %s4103_s2 = inlined_call_operand.vmem [shape: f32[512,1,32], index: 2, kind: input, shape index: {}]   ;;  %s4104_s3 = inlined_call_operand.vmem [shape: bf16[2,32,384], index: 3, kind: input, shape index: {}]   ;;  %s4105_s4 = inlined_call_operand.vmem [shape: bf16[2,128,32], index: 4, kind: input, shape index: {}]   ;;  %s4106_s5 = inlined_call_operand.vmem [shape: bf16[2,32,64], index: 5, kind: input, shape index: {}]   ;;  %s4107_s6 = inlined_call_operand.vmem [shape: bf16[2,64,32], index: 6, kind: input, shape index: {}]   ;;  %s4108_s7 = inlined_call_operand.vmem [shape: f32[2,8,64], index: 7, kind: input, shape index: {}]   ;;  %s4109_s8 = inlined_call_operand.vmem [shape: f32[32,10], index: 8, kind: input, shape index: {}]   ;;  %s4110_s9 = inlined_call_operand.vmem [shape: f32[1,10], index: 9, kind: input, shape index: {}]   ;;  %s4111_s10 = inlined_call_operand.hbm [shape: f32[2,1,10], index: 10, kind: output, shape index: {}]  }
   0x1   :  { %17 = vsyncpa [#allocation3 + $0x1], 0  ;;  %s3554_s13 = smov 0   ;;  %s3556_s14 = smov 0  }
   0x2   :  { %s3558_s15 = smov 0   ;;  %s3560_s16 = smov 0  }
   0x3 LB: > { %s3575_s17 = sadd.s32 4294967295, %s3489_s16   ;;  %s2866_s18 = sadd.s32 4294967294, %s3489_s16   ;;  %s3489_s16 = sphi %s3560_s16, %s4123_s16   ;;  %s3485_s15 = sphi %s3558_s15, %s4122_s15   ;;  %s3481_s14 = sphi %s3556_s14, %s4121_s14   ;;  %s3477_s13 = sphi %s3554_s13, %s4120_s13  }
   0x4   : > { %s3579_s19 = sadd.s32 1, %s3489_s16   ;;  %s250_s20 = sadd.s32 1, %s3485_s15 }
   0x5   : > { %s247_s21 = ssub.s32 %s3489_s16, %s3579_s19  ;;  %p260_p0 = scmp.ne.s32.totalorder %s3485_s15, %s3481_s14 }
   0x6   : > { %p248_p1 = scmp.eq.s32.totalorder %s247_s21, 0  ;;  %p261_p2 = scmp.eq.s32.totalorder %s3575_s17, 1 }
   0x7   : > { %p266_p3 = scmp.ne.s32.totalorder %s3481_s14, %s3477_s13  ;;  %p267_p4 = scmp.eq.s32.totalorder %s2866_s18, 1 }
   0x8   : > { %s3590_s22 = scalar_select %p248_p1, %s3485_s15, %s250_s20  }
   0x9   : > { %p3592_p5 = por %p261_p2, %p260_p0  ;;  %p3596_p6 = por %p267_p4, %p266_p3 }
   0xa   : > { %p2869_p7 = scmp.ge.s32.totalorder %s3489_s16, 1  ;;  %p322_p8 = scmp.lt.s32.totalorder %s3489_s16, 3 }
   0xc   : > { %p323_p9 = pnand %p2869_p7, %p322_p8 }
   0xd   : > { %p361_p10 = scmp.lt.s32.totalorder (!%p323_p9), %s3575_s17, 1  ;;  %v378_v0 = vld [vmem:[%s4102_s1] sm:$0xff] (!%p323_p9)  ;;  %v379_v1 = vld [vmem:[%s4102_s1 + $0x8] sm:$0xff] (!%p323_p9)  ;;  %v380_v2 = vld [vmem:[%s4102_s1 + $0x10] sm:$0xff] (!%p323_p9)  ;;  %v3491_v3 = vmov (!%p323_p9), 0   ;;  %v3492_v4 = vmov (!%p323_p9), 0.0|0.0   ;;  %v370_v15 = vlaneseq (!%p323_p9) }
   0xe   : > { %326 = sbr.rel (%p323_p9) target bundleno = 5975 (0x1757), region = 60  ;;  %3338 = vset.pattern.permute.xlu0 (!%p323_p9), %v3491_v3  ;;  %3277 = vmatprep.subr.bf16.mxu0 (!%p323_p9), %v3492_v4  ;;  %v3278_v5 = vpack.c.bf16 (!%p323_p9), %v379_v1, %v378_v0  ;;  %v381_v6 = vld [vmem:[%s4102_s1 + $0x18] sm:$0xff] (!%p323_p9)  ;;  %v382_v7 = vld [vmem:[%s4102_s1 + $0x20] sm:$0xff] (!%p323_p9)  ;;  %v383_v8 = vld [vmem:[%s4102_s1 + $0x28] sm:$0xff] (!%p323_p9)  ;;  %vm3493_vm0 = vmmov (!%p323_p9), 0   ;;  %v3494_v12 = vmov (!%p323_p9), 0.0  }
   0xf   : > { %550 = vmatprep.mubr.bf16.mxu1 (!%p323_p9), %v3491_v3  ;;  %v3281_v9 = vpack.c.bf16 (!%p323_p9), %v381_v6, %v380_v2  ;;  %v3284_v11 = vpack.c.bf16 (!%p323_p9), %v383_v8, %v382_v7  ;;  %3087 = vmatprep.mubr.msk.f32.mxu0 (!%p323_p9), %vm3493_vm0, %v3494_v12  ;;  %v3339_v13 = vld [vmem:[%s4104_s3 + $0x4] ss:$12 sps:$4 sm:$0xff] (!%p323_p9)   ;;  %vm389_vm1 = vcmask (!%p323_p9), 1041408   ;;  %v371_v16 = vand.u32 (!%p323_p9), 127, %v370_v15  ;;  %v3341_v19 = vld [vmem:[%s4104_s3] ss:$12 sps:$4 sm:$0xff] (!%p323_p9)  }
  0x10   : > { %3279 = vmatpush3.bf16.msra.mxu0 (!%p323_p9), %v3278_v5  ;;  %v384_v14 = vld [vmem:[%s4102_s1 + $0x30] sm:$0x3] (!%p323_p9)  ;;  %518 = vmatprep.subr.bf16.mxu1 (!%p323_p9), %v3339_v13  ;;  %vm385_vm2 = vcmask (!%p323_p9), 408576   ;;  %v3342_v20 = vld [vmem:[%s4104_s3 + $0x1c] ss:$12 sps:$4 sm:$0xff] (!%p323_p9)   ;;  %p365_p11 = scmp.lt.s32.totalorder (!%p323_p9), %s3575_s17, 511 }
  0x11   : > { %3280 = vmatprep.subr.bf16.mxu0 (!%p323_p9), %v3492_v4  ;;  %519 = vmatpush1.bf16.msra.mxu1 (!%p323_p9), %v3341_v19  ;;  %v3344_v21 = vld [vmem:[%s4104_s3 + $0x18] ss:$12 sps:$4 sm:$0xff] (!%p323_p9)   ;;  %vm514_vm4 = vcmask (!%p323_p9), 261120   ;;  %v3345_v27 = vld [vmem:[%s4104_s3 + $0x8] ss:$12 sps:$4 sm:$0xff] (!%p323_p9)   ;;  %s4114_s28 = smov (!%p323_p9), 64  }
  0x12   : > { %520 = vmatprep.subr.bf16.mxu1 (!%p323_p9), %v3342_v20  ;;  %v3346_v29 = vld [vmem:[%s4104_s3 + $0x20] ss:$12 sps:$4 sm:$0xff] (!%p323_p9)   ;;  %s4112_s29 = smov (!%p323_p9), 32   ;;  %vm923_vm5 = vcmask (!%p323_p9), 64512   ;;  %vm1273_vm6 = vcmask (!%p323_p9), 523264   ;;  %vm1275_vm7 = vcmask (!%p323_p9), 785408  }
  0x13   : > { %vm2775_vm8 = vcmask (!%p323_p9), 73728  }
  0x14   : > { %3282 = vmatpush3.bf16.msra.mxu0 (!%p323_p9), %v3281_v9 }
  0x15   : > { %s362_s18 = scalar_select %p361_p10, %s3575_s17, 1  ;;  %3283 = vmatprep.subr.bf16.mxu0 %v3492_v4  ;;  %521 = vmatpush1.bf16.msra.mxu1 %v3344_v21 }
  0x16   : > { %3090 = vmatprep.subr.bf16.mxu1 %v3494_v12 }
  0x17   : > { %s2870_s27 = sshll.u32 %s362_s18, 3 }
  0x18   : > { %s364_s30 = scalar_lea.vmem %s4101_s0, %s2870_s27  ;;  %3285 = vmatpush3.bf16.msra.mxu0 %v3284_v11  ;;  %s3495_s27 = smov 96  }
  0x19   : > { %v369_v10 = vld [vmem:[%s364_s30] sm:$0xff]  ;;  %3085 = vmatprep.subr.mxu0 %v3494_v12  ;;  %s366_s30 = scalar_select %p365_p11, %s3575_s17, 511 }
  0x1a   : > { %373 = vperm.xlu0 %3338, %v369_v10  }
  0x1b   : > { %s367_s18 = scalar_lea.vmem %s4103_s2, %s366_s30  ;;  %s2985_s30 = sshll.u32 %s3575_s17, 4 }
  0x1c   : > { %3086 = vmatpush3.msk.msra.mxu0 %vm389_vm1, %v384_v14  ;;  %v2874_v23 = vld [vmem:[%s367_s18] ss:$0 sm:$0xff]  ;;  %s4058_s20 = scalar_lea.hbm %s4111_s10, %s2985_s30  ;;  %s3498_s17 = smov [#allocation2]  }
  0x1d   : > { %3098 = vmatprep.subr.mxu0 %v3494_v12  ;;  %s3431_s25 = sshll.u32 %s3498_s17, 4  ;;  %s3432_s25 = int_to_ptr.vmem [resolvable:$false] %s3431_s25 }
  0x1e   : > { %s3433_s26 = scalar_lea.vmem %s3432_s25, 32 }
  0x99   : > { %v374_v17 = vpop.permute.xlu0 %373 }
  0x9a   : > { %vm375_vm3 = vcmp.eq.s32.totalorder %v374_v17, %v371_v16 }
  0x9b   : > { %v2871_v18 = vsel %vm375_vm3, 1.0, %v3494_v12 }
  0x9c   : > { %3088 = vmatmul.mubr.msk.f32.vlgmr.msra.gmra.mrb[0].mxu0 %vm385_vm2, %v2871_v18 }
  0x9d   : > { %3100 = vmatprep.mubr.msk.f32.mxu0 %vm3493_vm0, %v3494_v12 }
 0x16f   : > { %v459_v22 = vpop.f32.mrb[0].mxu0 }
 0x170   : > { %v463_v24 = vmul.f32 5.656854, %v459_v22  ;;  %v3089_v25 = vpop.f32.mrb[1].mxu0 }
 0x172   : > { %v3659_v26 = vadd.f32 %v2874_v23, %v463_v24 }
 0x174   : > { %v473_v28 = vpack.c.bf16 %v3659_v26, %v3659_v26 }
 0x176   : > { %2881 = vmatmul.mubr.msk.bf16.vlgmr.msra.gmra.mrb[0].mxu1 %vm514_vm4, %v473_v28 }
 0x177   : > { %3091 = vmatpush3.bf16.msra.mxu1 %v3345_v27  ;;  %3094 = vmatprep.mubr.msk.bf16.mxu1 %vm3493_vm0, %v3494_v12 }
 0x178   : > { %3092 = vmatprep.subr.bf16.mxu1 %v3494_v12 }
 0x17b   : > { %3093 = vmatpush3.bf16.msra.mxu1 %v3346_v29 }
 0x17c   : > { %3108 = vmatprep.subr.mxu1 %v3494_v12 }
 0x17e   : > { %3095 = vmatmul.mubr.msk.bf16.vlgmr.msra.gmra.mrb[4].mxu1 %vm514_vm4, %v473_v28 }
 0x17f   : > { %3110 = vmatprep.mubr.msk.f32.mxu1 %vm3493_vm0, %v3494_v12 }
 0x249   : > { %v552_v30 = vpop.f32.mrb[0].mxu1 }
 0x24a   : > { %600 = vrot.lane.b32.xlu1 %v552_v30, %s3495_s27  ;;  %v554_v31 = vpop.f32.mrb[1].mxu1 }
 0x24b   : > { %607 = vrot.lane.b32.xlu0 %v554_v31, %s3495_s27  ;;  %v556_v32 = vpop.f32.mrb[2].mxu1  ;;  %3099 = vmatpush3.xpose.msk.msra.mxu0 %vm514_vm4, %v554_v31 }
 0x24c   : > { %v557_v33 = vpop.f32.mrb[3].mxu1  ;;  %3103 = vmatprep.subr.mxu0 %v3494_v12 }
 0x24e   : > { %609 = vrot.lane.b32.xlu1 %v554_v31, %s4114_s28  ;;  %3101 = vmatmul.mubr.msk.f32.vlgmr.msra.gmra.mrb[2].mxu0 %vm514_vm4, %v552_v30 }
 0x24f   : > { %611 = vrot.lane.b32.xlu0 %v554_v31, %s4112_s29  ;;  %3105 = vmatprep.mubr.msk.f32.mxu0 %vm3493_vm0, %v3494_v12 }
 0x251   : > { %v3686_v34 = vpop.f32.mrb[4].mxu1 }
 0x252   : > { %602 = vrot.lane.b32.xlu1 %v552_v30, %s4114_s28  ;;  %v3096_v35 = vpop.f32.mrb[5].mxu1 }
 0x253   : > { %604 = vrot.lane.b32.xlu0 %v552_v30, %s4112_s29  ;;  %v596_v36 = vpop.f32.mrb[6].mxu1 }
 0x254   : > { %v3097_v37 = vpop.f32.mrb[7].mxu1 }
 0x2bc   : > { %v601_v38 = vpop.permute.xlu1 %600 }
 0x2bd   : > { %v608_v39 = vpop.permute.xlu0 %607 }
 0x2be   : > { %3104 = vmatpush3.xpose.msk.msra.mxu0 %vm514_vm4, %v608_v39  ;;  %v3348_v39 = vld [vmem:[%s4105_s4 + $0x8] sm:$0xff]  }
 0x2bf   : > { %3113 = vmatprep.subr.mxu0 %v3494_v12 }
 0x2c0   : > { %v610_v40 = vpop.permute.xlu1 %609 }
 0x2c1   : > { %3109 = vmatpush3.xpose.msk.msra.mxu1 %vm514_vm4, %v610_v40  ;;  %v612_v41 = vpop.permute.xlu0 %611  ;;  %3106 = vmatmul.mubr.msk.f32.vlgmr.msra.gmra.mrb[4].mxu0 %vm514_vm4, %v601_v38  ;;  %v3347_v38 = vld [vmem:[%s4105_s4] sm:$0xff]   ;;  %v3349_v40 = vld [vmem:[%s4105_s4 + $0x10] sm:$0xff]  }
 0x2c2   : > { %3114 = vmatpush3.xpose.msk.msra.mxu0 %vm514_vm4, %v612_v41  ;;  %3118 = vmatprep.subr.mxu1 %v3494_v12 }
 0x2c3   : > { %3115 = vmatprep.mubr.msk.f32.mxu0 %vm3493_vm0, %v3494_v12  ;;  %3123 = vmatprep.subr.mxu0 %v3494_v12 }
 0x2c4   : > { %v603_v42 = vpop.permute.xlu1 %602 }
 0x2c5   : > { %3111 = vmatmul.mubr.msk.f32.vlgmr.msra.gmra.mrb[8].mxu1 %vm514_vm4, %v603_v42  ;;  %v605_v43 = vpop.permute.xlu0 %604 }
 0x2c6   : > { %3119 = vmatpush3.msra.mxu1 %v3686_v34  ;;  %3116 = vmatmul.mubr.msk.f32.vlgmr.msra.gmra.mrb[6].mxu0 %vm514_vm4, %v605_v43  ;;  %v3350_v43 = vld [vmem:[%s4105_s4 + $0x18] sm:$0xff]  }
 0x2c7   : > { %3120 = vmatprep.mubr.msk.f32.mxu1 %vm3493_vm0, %v3494_v12  ;;  %3128 = vmatprep.subr.mxu1 %v3494_v12 }
 0x2c8   : > { %3125 = vmatprep.mubr.msk.f32.mxu0 %vm3493_vm0, %v3494_v12 }
 0x321   : > { %v693_v44 = vpop.f32.mrb[2].mxu0 }
 0x322   : > { %v919_v45 = vmul.f32 0.17677669, %v693_v44  ;;  %v3102_v46 = vpop.f32.mrb[3].mxu0 }
 0x323   : > { %v3351_v46 = vld [vmem:[%s4105_s4 + $0x20] sm:$0xff]  }
 0x324   : > { %v924_v47 = vsel %vm923_vm5, %v919_v45, -inf }
 0x325   : > { %925 = vmax.xlane.f32.xlu1 %v924_v47  ;;  %v3352_v47 = vld [vmem:[%s4105_s4 + $0x28] sm:$0xff]  }
 0x394   : > { %v767_v48 = vpop.f32.mrb[4].mxu0 }
 0x395   : > { %v920_v49 = vmul.f32 0.17677669, %v767_v48  ;;  %v3107_v50 = vpop.f32.mrb[5].mxu0  ;;  %v3353_v48 = vld [vmem:[%s4105_s4 + $0x30] sm:$0xff]  }
 0x397   : > { %v927_v51 = vsel %vm923_vm5, %v920_v49, -inf }
 0x398   : > { %v841_v52 = vpop.f32.mrb[8].mxu1  ;;  %928 = vmax.xlane.f32.xlu0 %v927_v51 }
 0x399   : > { %v921_v53 = vmul.f32 0.17677669, %v841_v52  ;;  %v3112_v54 = vpop.f32.mrb[9].mxu1  ;;  %v915_v55 = vpop.f32.mrb[6].mxu0 }
 0x39a   : > { %v922_v56 = vmul.f32 0.17677669, %v915_v55  ;;  %v3117_v57 = vpop.f32.mrb[7].mxu0 }
 0x39b   : > { %v930_v58 = vsel %vm923_vm5, %v921_v53, -inf }
 0x39c   : > { %931 = vmax.xlane.f32.xlu0 %v930_v58  ;;  %v933_v59 = vsel %vm923_vm5, %v922_v56, -inf }
 0x39d   : > { %934 = vmax.xlane.f32.xlu1 %v933_v59  ;;  %v3777_v59 = vshrl.u32 %v370_v15, 7 }
 0x3b2   : > { %v926_v60 = vpop.xlane.xlu1 %925 }
 0x3b3   : > { %v936_v61 = vsub.f32 %v919_v45, %v926_v60  ;;  %v1296_v60 = vsub.s32 0, %v3777_v59 }
 0x3b5   : > { %v940_v62 = vmul.f32 1.442695, %v936_v61  ;;  %v3783_v61 = vld [vmem:[%s4108_s7] sm:$0xff] }
 0x3b7   : > { %3383 = vpow2.f32 %v940_v62  ;;  %v1297_v62 = vrot.slane %v3783_v61, %v1296_v60 }
 0x3c1   : > { %v3384_v63 = vpop.eup %3383 }
 0x3c2   : > { %v948_v0 = vsel %vm923_vm5, %v3384_v63, 0.0 }
 0x3c3   : > { %949 = vadd.xlane.f32.xlu0 %v948_v0 }
 0x425   : > { %v929_v1 = vpop.xlane.xlu0 %928 }
 0x426   : > { %v937_v2 = vsub.f32 %v920_v49, %v929_v1  ;;  %v3354_v49 = vld [vmem:[%s4105_s4 + $0x38] sm:$0xff]  }
 0x428   : > { %v942_v5 = vmul.f32 1.442695, %v937_v2 }
 0x429   : > { %v932_v6 = vpop.xlane.xlu0 %931 }
 0x42a   : > { %3385 = vpow2.f32 %v942_v5  ;;  %v938_v7 = vsub.f32 %v921_v53, %v932_v6  ;;  %v935_v16 = vpop.xlane.xlu1 %934 }
 0x42b   : > { %v939_v17 = vsub.f32 %v922_v56, %v935_v16 }
 0x42c   : > { %v944_v8 = vmul.f32 1.442695, %v938_v7 }
 0x42d   : > { %v946_v18 = vmul.f32 1.442695, %v939_v17 }
 0x42e   : > { %3387 = vpow2.f32 %v944_v8 }
 0x434   : > { %v3386_v9 = vpop.eup %3385 }
 0x435   : > { %v951_v10 = vsel %vm923_vm5, %v3386_v9, 0.0 }
 0x436   : > { %952 = vadd.xlane.f32.xlu1 %v951_v10 }
 0x438   : > { %v3388_v11 = vpop.eup %3387 }
 0x439   : > { %v954_v13 = vsel %vm923_vm5, %v3388_v11, 0.0 }
 0x43a   : > { %955 = vadd.xlane.f32.xlu0 %v954_v13  ;;  %v3355_v13 = vld [vmem:[%s4106_s5] sm:$0xff]  }
 0x447   : > { %617 = vrot.lane.b32.xlu1 %v3686_v34, %s4114_s28 }
 0x450   : > { %614 = vrot.lane.b32.xlu0 %v3686_v34, %s3495_s27  ;;  %v950_v14 = vpop.xlane.xlu0 %949 }
 0x451   : > { %3389 = vrcp.f32 %v950_v14  ;;  %v3356_v14 = vld [vmem:[%s4106_s5 + $0x8] sm:$0xff]  }
 0x452   : > { %3391 = vpow2.f32 %v946_v18  ;;  %v1403_v18 = vsub.s32 1, %v3777_v59 }
 0x45b   : > { %v3390_v19 = vpop.eup %3389 }
 0x45c   : > { %v961_v20 = vmul.f32 %v3390_v19, %v3384_v63  ;;  %v3392_v21 = vpop.eup %3391  ;;  %v1408_v19 = vsub.s32 2, %v3777_v59 }
 0x45d   : > { %v957_v22 = vsel %vm923_vm5, %v3392_v21, 0.0 }
 0x45e   : > { %3121 = vmatmul.mubr.msk.f32.vlgmr.msra.gmra.mrb[10].mxu1 %vm923_vm5, %v961_v20  ;;  %v1404_v20 = vrot.slane %v3783_v61, %v1403_v18 }
 0x45f   : > { %3130 = vmatprep.mubr.msk.f32.mxu1 %vm3493_vm0, %v3494_v12 }
 0x46b   : > { %958 = vadd.xlane.f32.xlu1 %v957_v22 }
 0x47c   : > { %620 = vrot.lane.b32.xlu1 %v3686_v34, %s4112_s29 }
 0x4c3   : > { %v953_v23 = vpop.xlane.xlu1 %952 }
 0x4c4   : > { %3393 = vrcp.f32 %v953_v23  ;;  %v1409_v23 = vrot.slane %v3783_v61, %v1408_v19 }
 0x4c7   : > { %v956_v24 = vpop.xlane.xlu0 %955  ;;  %v618_v25 = vpop.permute.xlu1 %617 }
 0x4c8   : > { %3395 = vrcp.f32 %v956_v24  ;;  %3129 = vmatpush3.msra.mxu1 %v618_v25 }
 0x4c9   : > { %3138 = vmatprep.subr.bf16.mxu1 %v3494_v12 }
 0x4cb   : > { %v615_v27 = vpop.permute.xlu0 %614 }
 0x4cc   : > { %3124 = vmatpush3.msra.mxu0 %v615_v27  ;;  %v3357_v27 = vld [vmem:[%s4107_s6] sm:$0xff]  }
 0x4cd   : > { %3133 = vmatprep.subr.mxu0 %v3494_v12 }
 0x4ce   : > { %v3394_v28 = vpop.eup %3393 }
 0x4cf   : > { %v963_v29 = vmul.f32 %v3394_v28, %v3386_v9 }
 0x4d1   : > { %3126 = vmatmul.mubr.msk.f32.vlgmr.msra.gmra.mrb[8].mxu0 %vm923_vm5, %v963_v29  ;;  %v3358_v29 = vld [vmem:[%s4107_s6 + $0x8] sm:$0xff]  }
 0x4d2   : > { %v3396_v30 = vpop.eup %3395  ;;  %3135 = vmatprep.mubr.msk.f32.mxu0 %vm3493_vm0, %v3494_v12 }
 0x4d3   : > { %v965_v31 = vmul.f32 %v3396_v30, %v3388_v11  ;;  %v3359_v30 = vld [vmem:[%s4107_s6 + $0x10] sm:$0xff]  }
 0x4d5   : > { %3131 = vmatmul.mubr.msk.f32.vlgmr.msra.gmra.mrb[12].mxu1 %vm923_vm5, %v965_v31  ;;  %v3360_v31 = vld [vmem:[%s4107_s6 + $0x18] sm:$0xff]  }
 0x4d6   : > { %3154 = vmatprep.mubr.msk.bf16.mxu1 %vm3493_vm0, %v3494_v12  ;;  %3139 = vmatpush3.bf16.msra.mxu1 %v3347_v38 }
 0x4d7   : > { %3140 = vmatprep.subr.bf16.mxu1 %v3494_v12 }
 0x4da   : > { %3141 = vmatpush3.bf16.msra.mxu1 %v3348_v39 }
 0x4db   : > { %3142 = vmatprep.subr.bf16.mxu1 %v3494_v12 }
 0x4de   : > { %3143 = vmatpush3.bf16.msra.mxu1 %v3349_v40 }
 0x4df   : > { %3144 = vmatprep.subr.bf16.mxu1 %v3494_v12 }
 0x4e2   : > { %3145 = vmatpush3.bf16.msra.mxu1 %v3350_v43 }
 0x4e3   : > { %3146 = vmatprep.subr.bf16.mxu1 %v3494_v12 }
 0x4e6   : > { %3147 = vmatpush3.bf16.msra.mxu1 %v3351_v46 }
 0x4e7   : > { %3148 = vmatprep.subr.bf16.mxu1 %v3494_v12 }
 0x4ea   : > { %3149 = vmatpush3.bf16.msra.mxu1 %v3352_v47 }
 0x4eb   : > { %3150 = vmatprep.subr.bf16.mxu1 %v3494_v12 }
 0x4ee   : > { %3151 = vmatpush3.bf16.msra.mxu1 %v3353_v48 }
 0x4ef   : > { %3152 = vmatprep.subr.bf16.mxu1 %v3494_v12 }
 0x4f2   : > { %3153 = vmatpush3.bf16.msra.mxu1 %v3354_v49 }
 0x4f3   : > { %3178 = vmatprep.subr.bf16.mxu1 %v3494_v12 }
 0x4f8   : > { %v959_v32 = vpop.xlane.xlu1 %958 }
 0x4f9   : > { %3397 = vrcp.f32 %v959_v32  ;;  %v1418_v32 = vsub.s32 3, %v3777_v59 }
 0x4fc   : > { %v621_v33 = vpop.permute.xlu1 %620 }
 0x4fd   : > { %3134 = vmatpush3.msra.mxu0 %v621_v33  ;;  %v1419_v33 = vrot.slane %v3783_v61, %v1418_v32 }
 0x4fe   : > { %3158 = vmatprep.subr.bf16.mxu0 %v3494_v12 }
 0x503   : > { %v3398_v34 = vpop.eup %3397 }
 0x504   : > { %v967_v35 = vmul.f32 %v3398_v34, %v3392_v21 }
 0x506   : > { %3136 = vmatmul.mubr.msk.f32.vlgmr.msra.gmra.mrb[10].mxu0 %vm923_vm5, %v967_v35 }
 0x507   : > { %3162 = vmatprep.mubr.msk.bf16.mxu0 %vm3493_vm0, %v3494_v12  ;;  %3159 = vmatpush3.bf16.msra.mxu0 %v3355_v13 }
 0x508   : > { %3160 = vmatprep.subr.bf16.mxu0 %v3494_v12 }
 0x50b   : > { %3161 = vmatpush3.bf16.msra.mxu0 %v3356_v14 }
 0x50c   : > { %3166 = vmatprep.subr.bf16.mxu0 %v3494_v12 }
 0x531   : > { %v1037_v36 = vpop.f32.mrb[10].mxu1 }
 0x532   : > { %v3122_v37 = vpop.f32.mrb[11].mxu1 }
 0x5a4   : > { %v1110_v41 = vpop.f32.mrb[8].mxu0 }
 0x5a5   : > { %1261 = vrot.lane.b32.xlu0 %v1110_v41, %s4112_s29  ;;  %v3127_v42 = vpop.f32.mrb[9].mxu0  ;;  %v1487_v41 = vsub.s32 4, %v3777_v59  ;;  %s4119_s29 = smov 32  }
 0x5a7   : > { %v1488_v42 = vrot.slane %v3783_v61, %v1487_v41 }
 0x5a8   : > { %v1183_v44 = vpop.f32.mrb[12].mxu1 }
 0x5a9   : > { %1265 = vrot.lane.b32.xlu1 %v1183_v44, %s4114_s28  ;;  %v3132_v45 = vpop.f32.mrb[13].mxu1  ;;  %s4118_s28 = smov 64  }
 0x5d9   : > { %v1256_v50 = vpop.f32.mrb[10].mxu0 }
 0x5da   : > { %1269 = vrot.lane.b32.xlu0 %v1256_v50, %s3495_s27  ;;  %v3137_v51 = vpop.f32.mrb[11].mxu0 }
 0x617   : > { %v1262_v52 = vpop.permute.xlu0 %1261 }
 0x618   : > { %v1272_v54 = vsel %vm514_vm4, %v1037_v36, %v1262_v52 }
 0x61b   : > { %v1266_v53 = vpop.permute.xlu1 %1265 }
 0x61c   : > { %v1274_v55 = vsel %vm1273_vm6, %v1272_v54, %v1266_v53  ;;  %v3363_v54 = vld [vmem:[%s4104_s3 + $0x34] ss:$12 sps:$4 sm:$0xff]  }
 0x64c   : > { %v1270_v56 = vpop.permute.xlu0 %1269 }
 0x64d   : > { %v1276_v57 = vsel %vm1275_vm7, %v1274_v55, %v1270_v56  ;;  %v3361_v55 = vld [vmem:[%s4104_s3 + $0x30] ss:$12 sps:$4 sm:$0xff]   ;;  %v3364_v56 = vld [vmem:[%s4104_s3 + $0x38] ss:$12 sps:$4 sm:$0xff]  }
 0x64e   : > { %v1277_v58 = vpack.c.bf16 %v1276_v57, %v1276_v57  ;;  %v3365_v57 = vld [vmem:[%s4104_s3 + $0x48] ss:$12 sps:$4 sm:$0xff]  }
 0x650   : > { %3155 = vmatmul.mubr.bf16.vlgmr.msra.gmra.mrb[16].mxu1 %v1277_v58  ;;  %v3367_v58 = vld [vmem:[%s4104_s3 + $0x4c] ss:$12 sps:$4 sm:$0xff]  }
 0x651   : > { %3182 = vmatprep.mubr.msk.bf16.mxu1 %vm3493_vm0, %v3494_v12  ;;  %3179 = vmatpush3.bf16.msra.mxu1 %v3364_v56 }
 0x652   : > { %3180 = vmatprep.subr.bf16.mxu1 %v3494_v12 }
 0x723   : > { %v1380_v63 = vpop.f32.mrb[16].mxu1 }
 0x724   : > { %v1381_v0 = vadd.f32 %v1380_v63, %v1297_v62  ;;  %v3156_v1 = vpop.f32.mrb[17].mxu1  ;;  %v3368_v62 = vld [vmem:[%s4104_s3 + $0x50] ss:$12 sps:$4 sm:$0xff]  }
 0x725   : > { %v1383_v2 = vpop.f32.mrb[18].mxu1  ;;  %3181 = vmatpush3.bf16.msra.mxu1 %v3368_v62 }
 0x726   : > { %v3157_v5 = vpop.f32.mrb[19].mxu1  ;;  %v1386_v6 = vadd.f32 %v1381_v0, %v3659_v26  ;;  %3196 = vmatprep.subr.mxu1 %v3494_v12  ;;  %v1572_v2 = vsub.s32 5, %v3777_v59 }
 0x727   : > { %v1577_v5 = vsub.s32 6, %v3777_v59  ;;  %v2701_v59 = vld [vmem:[%s4110_s9] sm:$0x1] }
 0x728   : > { %v1387_v15 = vsel %vm514_vm4, %v1386_v6, 0.0 }
 0x729   : > { %1388 = vadd.xlane.f32.xlu1 %v1387_v15 }
 0x7b6   : > { %v1389_v7 = vpop.xlane.xlu1 %1388 }
 0x7b7   : > { %v1391_v8 = vmul.f32 0.03125, %v1389_v7 }
 0x7b9   : > { %v1392_v9 = vsub.f32 %v1386_v6, %v1391_v8  ;;  %v1573_v6 = vrot.slane %v3783_v61, %v1572_v2  ;;  %v1578_v8 = vrot.slane %v3783_v61, %v1577_v5 }
 0x7bb   : > { %v1393_v10 = vmul.f32 %v1392_v9, %v1392_v9 }
 0x7bd   : > { %v1394_v11 = vsel %vm514_vm4, %v1393_v10, 0.0 }
 0x7be   : > { %1395 = vadd.xlane.f32.xlu0 %v1394_v11 }
 0x84b   : > { %v1396_v26 = vpop.xlane.xlu0 %1395 }
 0x84c   : > { %v1397_v16 = vmul.f32 0.03125, %v1396_v26 }
 0x84e   : > { %v1398_v17 = vadd.f32 1e-05, %v1397_v16 }
 0x850   : > { %3399 = vrsqrt.f32 %v1398_v17 }
 0x85a   : > { %v3400_v21 = vpop.eup %3399 }
 0x85b   : > { %v1400_v22 = vmul.f32 %v3400_v21, %v1392_v9 }
 0x85d   : > { %v1405_v24 = vmul.f32 %v1404_v20, %v1400_v22 }
 0x85f   : > { %v1410_v25 = vadd.f32 %v1409_v23, %v1405_v24 }
 0x861   : > { %v1411_v28 = vpack.c.bf16 %v1410_v25, %v1410_v25 }
 0x863   : > { %3163 = vmatmul.mubr.msk.bf16.vlgmr.msra.gmra.mrb[12].mxu0 %vm514_vm4, %v1411_v28 }
 0x864   : > { %3167 = vmatpush3.bf16.msra.mxu0 %v3357_v27  ;;  %3174 = vmatprep.mubr.msk.bf16.mxu0 %vm3493_vm0, %v3494_v12 }
 0x865   : > { %3168 = vmatprep.subr.bf16.mxu0 %v3494_v12 }
 0x868   : > { %3169 = vmatpush3.bf16.msra.mxu0 %v3358_v29 }
 0x869   : > { %3170 = vmatprep.subr.bf16.mxu0 %v3494_v12 }
 0x86c   : > { %3171 = vmatpush3.bf16.msra.mxu0 %v3359_v30 }
 0x86d   : > { %3172 = vmatprep.subr.bf16.mxu0 %v3494_v12 }
 0x870   : > { %3173 = vmatpush3.bf16.msra.mxu0 %v3360_v31 }
 0x871   : > { %1627 = vmatprep.subr.bf16.mxu0 %v3363_v54 }
 0x936   : > { %v1469_v34 = vpop.f32.mrb[12].mxu0 }
 0x937   : > { %v1470_v35 = vadd.f32 %v1469_v34, %v1419_v33  ;;  %v3164_v36 = vpop.f32.mrb[13].mxu0 }
 0x938   : > { %v1472_v37 = vpop.f32.mrb[14].mxu0 }
 0x939   : > { %v1475_v38 = vmax.f32 %v1470_v35, 0.0  ;;  %v3165_v39 = vpop.f32.mrb[15].mxu0 }
 0x93b   : > { %v1476_v40 = vpack.c.bf16 %v1475_v38, %v1475_v38 }
 0x93d   : > { %3175 = vmatmul.mubr.msk.bf16.vlgmr.msra.gmra.mrb[16].mxu0 %vm1273_vm6, %v1476_v40 }
 0x93e   : > { %1659 = vmatprep.mubr.bf16.mxu0 %v3491_v3  ;;  %1628 = vmatpush1.bf16.msra.mxu0 %v3361_v55 }
 0x93f   : > { %1629 = vmatprep.subr.bf16.mxu0 %v3367_v58 }
 0x942   : > { %1630 = vmatpush1.bf16.msra.mxu0 %v3365_v57 }
 0x943   : > { %3186 = vmatprep.subr.mxu0 %v3494_v12 }
 0xa10   : > { %v1550_v43 = vpop.f32.mrb[16].mxu0 }
 0xa11   : > { %v1551_v44 = vadd.f32 %v1550_v43, %v1488_v42  ;;  %v3176_v45 = vpop.f32.mrb[17].mxu0 }
 0xa12   : > { %v1553_v46 = vpop.f32.mrb[18].mxu0 }
 0xa13   : > { %v3177_v47 = vpop.f32.mrb[19].mxu0  ;;  %v1556_v48 = vadd.f32 %v1551_v44, %v1410_v25 }
 0xa15   : > { %v1557_v49 = vsel %vm514_vm4, %v1556_v48, 0.0 }
 0xa16   : > { %1558 = vadd.xlane.f32.xlu0 %v1557_v49 }
 0xaa3   : > { %v1559_v50 = vpop.xlane.xlu0 %1558 }
 0xaa4   : > { %v1560_v51 = vmul.f32 0.03125, %v1559_v50 }
 0xaa6   : > { %v1561_v52 = vsub.f32 %v1556_v48, %v1560_v51 }
 0xaa8   : > { %v1562_v53 = vmul.f32 %v1561_v52, %v1561_v52 }
 0xaaa   : > { %v1563_v3 = vsel %vm514_vm4, %v1562_v53, 0.0 }
 0xaab   : > { %1564 = vadd.xlane.f32.xlu1 %v1563_v3 }
 0xb38   : > { %v1565_v63 = vpop.xlane.xlu1 %1564 }
 0xb39   : > { %v1566_v0 = vmul.f32 0.03125, %v1565_v63 }
 0xb3b   : > { %v1567_v1 = vadd.f32 1e-05, %v1566_v0 }
 0xb3d   : > { %3401 = vrsqrt.f32 %v1567_v1 }
 0xb47   : > { %v3402_v15 = vpop.eup %3401 }
 0xb48   : > { %v1569_v7 = vmul.f32 %v3402_v15, %v1561_v52 }
 0xb4a   : > { %v1574_v9 = vmul.f32 %v1573_v6, %v1569_v7 }
 0xb4c   : > { %v3866_v10 = vadd.f32 %v1578_v8, %v1574_v9 }
 0xb4e   : > { %v1582_v11 = vpack.c.bf16 %v3866_v10, %v3866_v10 }
 0xb50   : > { %2926 = vmatmul.mubr.msk.bf16.vlgmr.msra.gmra.mrb[20].mxu0 %vm514_vm4, %v1582_v11  ;;  %3183 = vmatmul.mubr.msk.bf16.vlgmr.msra.gmra.mrb[20].mxu1 %vm514_vm4, %v1582_v11 }
 0xb51   : > { %3188 = vmatprep.mubr.msk.f32.mxu0 %vm3493_vm0, %v3494_v12  ;;  %3198 = vmatprep.mubr.msk.f32.mxu1 %vm3493_vm0, %v3494_v12 }
 0xc23   : > { %v1661_v13 = vpop.f32.mrb[20].mxu0  ;;  %v3876_v14 = vpop.f32.mrb[20].mxu1 }
 0xc24   : > { %v3184_v61 = vpop.f32.mrb[21].mxu1  ;;  %1709 = vrot.lane.b32.xlu1 %v1661_v13, %s3495_s27  ;;  %v1663_v26 = vpop.f32.mrb[21].mxu0 }
 0xc25   : > { %v1705_v16 = vpop.f32.mrb[22].mxu1  ;;  %1716 = vrot.lane.b32.xlu0 %v1663_v26, %s3495_s27  ;;  %v1665_v17 = vpop.f32.mrb[22].mxu0  ;;  %3187 = vmatpush3.xpose.msk.msra.mxu0 %vm514_vm4, %v1663_v26 }
 0xc26   : > { %v1666_v20 = vpop.f32.mrb[23].mxu0  ;;  %v3185_v21 = vpop.f32.mrb[23].mxu1  ;;  %3191 = vmatprep.subr.mxu0 %v3494_v12 }
 0xc28   : > { %1718 = vrot.lane.b32.xlu1 %v1663_v26, %s4118_s28  ;;  %3189 = vmatmul.mubr.msk.f32.vlgmr.msra.gmra.mrb[24].mxu0 %vm514_vm4, %v1661_v13 }
 0xc29   : > { %1720 = vrot.lane.b32.xlu0 %v1663_v26, %s4119_s29  ;;  %3193 = vmatprep.mubr.msk.f32.mxu0 %vm3493_vm0, %v3494_v12 }
 0xc2c   : > { %1711 = vrot.lane.b32.xlu1 %v1661_v13, %s4118_s28 }
 0xc2d   : > { %1713 = vrot.lane.b32.xlu0 %v1661_v13, %s4119_s29 }
 0xc96   : > { %v1710_v22 = vpop.permute.xlu1 %1709 }
 0xc97   : > { %v1717_v23 = vpop.permute.xlu0 %1716 }
 0xc98   : > { %3192 = vmatpush3.xpose.msk.msra.mxu0 %vm514_vm4, %v1717_v23 }
 0xc99   : > { %3201 = vmatprep.subr.mxu0 %v3494_v12 }
 0xc9a   : > { %v1719_v24 = vpop.permute.xlu1 %1718 }
 0xc9b   : > { %3197 = vmatpush3.xpose.msk.msra.mxu1 %vm514_vm4, %v1719_v24  ;;  %v1721_v25 = vpop.permute.xlu0 %1720  ;;  %3194 = vmatmul.mubr.msk.f32.vlgmr.msra.gmra.mrb[26].mxu0 %vm514_vm4, %v1710_v22 }
 0xc9c   : > { %3202 = vmatpush3.xpose.msk.msra.mxu0 %vm514_vm4, %v1721_v25  ;;  %3206 = vmatprep.subr.mxu1 %v3494_v12 }
 0xc9d   : > { %3203 = vmatprep.mubr.msk.f32.mxu0 %vm3493_vm0, %v3494_v12  ;;  %3211 = vmatprep.subr.mxu0 %v3494_v12 }
 0xc9e   : > { %v1712_v27 = vpop.permute.xlu1 %1711 }
 0xc9f   : > { %3199 = vmatmul.mubr.msk.f32.vlgmr.msra.gmra.mrb[14].mxu1 %vm514_vm4, %v1712_v27  ;;  %v1714_v28 = vpop.permute.xlu0 %1713 }
 0xca0   : > { %3207 = vmatpush3.msra.mxu1 %v3876_v14  ;;  %3204 = vmatmul.mubr.msk.f32.vlgmr.msra.gmra.mrb[28].mxu0 %vm514_vm4, %v1714_v28 }
 0xca1   : > { %3208 = vmatprep.mubr.msk.f32.mxu1 %vm3493_vm0, %v3494_v12  ;;  %3216 = vmatprep.subr.mxu1 %v3494_v12 }
 0xca2   : > { %3213 = vmatprep.mubr.msk.f32.mxu0 %vm3493_vm0, %v3494_v12 }
 0xcfb   : > { %v1802_v29 = vpop.f32.mrb[24].mxu0 }
 0xcfc   : > { %v2028_v30 = vmul.f32 0.17677669, %v1802_v29  ;;  %v3190_v31 = vpop.f32.mrb[25].mxu0  ;;  %v3369_v29 = vld [vmem:[%s4105_s4 + $0x40] sm:$0xff]  }
 0xcfd   : > { %v3371_v31 = vld [vmem:[%s4105_s4 + $0x50] sm:$0xff]  }
 0xcfe   : > { %v2032_v33 = vsel %vm923_vm5, %v2028_v30, -inf }
 0xcff   : > { %2033 = vmax.xlane.f32.xlu1 %v2032_v33 }
 0xd6e   : > { %v1876_v34 = vpop.f32.mrb[26].mxu0 }
 0xd6f   : > { %v2029_v35 = vmul.f32 0.17677669, %v1876_v34  ;;  %v3195_v36 = vpop.f32.mrb[27].mxu0 }
 0xd71   : > { %v2035_v37 = vsel %vm923_vm5, %v2029_v35, -inf }
 0xd72   : > { %v1950_v38 = vpop.f32.mrb[14].mxu1  ;;  %2036 = vmax.xlane.f32.xlu0 %v2035_v37 }
 0xd73   : > { %v2030_v39 = vmul.f32 0.17677669, %v1950_v38  ;;  %v3200_v40 = vpop.f32.mrb[15].mxu1  ;;  %v2024_v42 = vpop.f32.mrb[28].mxu0  ;;  %v3373_v38 = vld [vmem:[%s4105_s4 + $0x60] sm:$0xff]  }
 0xd74   : > { %v2031_v43 = vmul.f32 0.17677669, %v2024_v42  ;;  %v3205_v44 = vpop.f32.mrb[29].mxu0  ;;  %v3375_v40 = vld [vmem:[%s4105_s4 + $0x70] sm:$0xff]   ;;  %v3376_v42 = vld [vmem:[%s4105_s4 + $0x78] sm:$0xff]  }
 0xd75   : > { %v2038_v45 = vsel %vm923_vm5, %v2030_v39, -inf }
 0xd76   : > { %2039 = vmax.xlane.f32.xlu0 %v2038_v45  ;;  %v2041_v46 = vsel %vm923_vm5, %v2031_v43, -inf }
 0xd77   : > { %2042 = vmax.xlane.f32.xlu1 %v2041_v46 }
 0xd8c   : > { %v2034_v47 = vpop.xlane.xlu1 %2033 }
 0xd8d   : > { %v2044_v48 = vsub.f32 %v2028_v30, %v2034_v47  ;;  %v3370_v30 = vld [vmem:[%s4105_s4 + $0x48] sm:$0xff]  }
 0xd8f   : > { %v2048_v49 = vmul.f32 1.442695, %v2044_v48 }
 0xd91   : > { %3403 = vpow2.f32 %v2048_v49 }
 0xd9b   : > { %v3404_v50 = vpop.eup %3403 }
 0xd9c   : > { %v2056_v51 = vsel %vm923_vm5, %v3404_v50, 0.0 }
 0xd9d   : > { %2057 = vadd.xlane.f32.xlu0 %v2056_v51 }
 0xdff   : > { %v2037_v52 = vpop.xlane.xlu0 %2036 }
 0xe00   : > { %v2045_v53 = vsub.f32 %v2029_v35, %v2037_v52  ;;  %v3372_v35 = vld [vmem:[%s4105_s4 + $0x58] sm:$0xff]   ;;  %v3975_v52 = vld [vmem:[%s4108_s7 + $0x8] sm:$0xff] }
 0xe02   : > { %v2050_v3 = vmul.f32 1.442695, %v2045_v53  ;;  %v2404_v53 = vrot.slane %v3975_v52, %v1296_v60  ;;  %v3377_v60 = vld [vmem:[%s4106_s5 + $0x10] sm:$0xff]  }
 0xe03   : > { %v2040_v54 = vpop.xlane.xlu0 %2039 }
 0xe04   : > { %3405 = vpow2.f32 %v2050_v3  ;;  %v2046_v55 = vsub.f32 %v2030_v39, %v2040_v54  ;;  %v2043_v1 = vpop.xlane.xlu1 %2042  ;;  %v3374_v39 = vld [vmem:[%s4105_s4 + $0x68] sm:$0xff]  }
 0xe05   : > { %v2047_v6 = vsub.f32 %v2031_v43, %v2043_v1 }
 0xe06   : > { %v2052_v56 = vmul.f32 1.442695, %v2046_v55 }
 0xe07   : > { %v2054_v15 = vmul.f32 1.442695, %v2047_v6 }
 0xe08   : > { %3407 = vpow2.f32 %v2052_v56 }
 0xe0e   : > { %v3406_v57 = vpop.eup %3405 }
 0xe0f   : > { %v2059_v58 = vsel %vm923_vm5, %v3406_v57, 0.0 }
 0xe10   : > { %2060 = vadd.xlane.f32.xlu1 %v2059_v58 }
 0xe12   : > { %v3408_v62 = vpop.eup %3407 }
 0xe13   : > { %v2062_v63 = vsel %vm923_vm5, %v3408_v62, 0.0 }
 0xe14   : > { %2063 = vadd.xlane.f32.xlu0 %v2062_v63 }
 0xe21   : > { %1726 = vrot.lane.b32.xlu1 %v3876_v14, %s4118_s28 }
 0xe2a   : > { %1723 = vrot.lane.b32.xlu0 %v3876_v14, %s3495_s27  ;;  %v2058_v0 = vpop.xlane.xlu0 %2057 }
 0xe2b   : > { %3409 = vrcp.f32 %v2058_v0 }
 0xe2c   : > { %3411 = vpow2.f32 %v2054_v15 }
 0xe35   : > { %v3410_v7 = vpop.eup %3409 }
 0xe36   : > { %v2069_v8 = vmul.f32 %v3410_v7, %v3404_v50  ;;  %v3412_v9 = vpop.eup %3411  ;;  %v3378_v7 = vld [vmem:[%s4106_s5 + $0x18] sm:$0xff]  }
 0xe37   : > { %v2065_v11 = vsel %vm923_vm5, %v3412_v9, 0.0 }
 0xe38   : > { %3209 = vmatmul.mubr.msk.f32.vlgmr.msra.gmra.mrb[24].mxu1 %vm923_vm5, %v2069_v8 }
 0xe39   : > { %3218 = vmatprep.mubr.msk.f32.mxu1 %vm3493_vm0, %v3494_v12 }
 0xe45   : > { %2066 = vadd.xlane.f32.xlu1 %v2065_v11  ;;  %v2510_v11 = vrot.slane %v3975_v52, %v1403_v18  ;;  %v3380_v18 = vld [vmem:[%s4107_s6 + $0x28] sm:$0xff]  }
 0xe56   : > { %1729 = vrot.lane.b32.xlu1 %v3876_v14, %s4119_s29 }
 0xe9d   : > { %v2061_v13 = vpop.xlane.xlu1 %2060 }
 0xe9e   : > { %3413 = vrcp.f32 %v2061_v13 }
 0xea1   : > { %v2064_v61 = vpop.xlane.xlu0 %2063  ;;  %v1727_v26 = vpop.permute.xlu1 %1726 }
 0xea2   : > { %3415 = vrcp.f32 %v2064_v61  ;;  %3217 = vmatpush3.msra.mxu1 %v1727_v26  ;;  %v2515_v26 = vrot.slane %v3975_v52, %v1408_v19  ;;  %v3381_v19 = vld [vmem:[%s4107_s6 + $0x30] sm:$0xff]  }
 0xea3   : > { %3226 = vmatprep.subr.bf16.mxu1 %v3494_v12 }
 0xea5   : > { %v1724_v16 = vpop.permute.xlu0 %1723 }
 0xea6   : > { %3212 = vmatpush3.msra.mxu0 %v1724_v16 }
 0xea7   : > { %3221 = vmatprep.subr.mxu0 %v3494_v12 }
 0xea8   : > { %v3414_v17 = vpop.eup %3413 }
 0xea9   : > { %v2071_v20 = vmul.f32 %v3414_v17, %v3406_v57 }
 0xeab   : > { %3214 = vmatmul.mubr.msk.f32.vlgmr.msra.gmra.mrb[30].mxu0 %vm923_vm5, %v2071_v20  ;;  %v3379_v20 = vld [vmem:[%s4107_s6 + $0x20] sm:$0xff]  }
 0xeac   : > { %v3416_v21 = vpop.eup %3415  ;;  %3223 = vmatprep.mubr.msk.f32.mxu0 %vm3493_vm0, %v3494_v12 }
 0xead   : > { %v2073_v14 = vmul.f32 %v3416_v21, %v3408_v62 }
 0xeaf   : > { %3219 = vmatmul.mubr.msk.f32.vlgmr.msra.gmra.mrb[26].mxu1 %vm923_vm5, %v2073_v14  ;;  %v3382_v14 = vld [vmem:[%s4107_s6 + $0x38] sm:$0xff]  }
 0xeb0   : > { %3242 = vmatprep.mubr.msk.bf16.mxu1 %vm3493_vm0, %v3494_v12  ;;  %3227 = vmatpush3.bf16.msra.mxu1 %v3369_v29 }
 0xeb1   : > { %3228 = vmatprep.subr.bf16.mxu1 %v3494_v12 }
 0xeb4   : > { %3229 = vmatpush3.bf16.msra.mxu1 %v3370_v30 }
 0xeb5   : > { %3230 = vmatprep.subr.bf16.mxu1 %v3494_v12 }
 0xeb8   : > { %3231 = vmatpush3.bf16.msra.mxu1 %v3371_v31  ;;  %v2596_v31 = vrot.slane %v3975_v52, %v1487_v41  ;;  %v2698_v41 = vld [vmem:[%s4109_s8 + $0x8] sm:$0xff] }
 0xeb9   : > { %3232 = vmatprep.subr.bf16.mxu1 %v3494_v12 }
 0xebc   : > { %3233 = vmatpush3.bf16.msra.mxu1 %v3372_v35 }
 0xebd   : > { %3234 = vmatprep.subr.bf16.mxu1 %v3494_v12 }
 0xec0   : > { %3235 = vmatpush3.bf16.msra.mxu1 %v3373_v38 }
 0xec1   : > { %3236 = vmatprep.subr.bf16.mxu1 %v3494_v12 }
 0xec4   : > { %3237 = vmatpush3.bf16.msra.mxu1 %v3374_v39 }
 0xec5   : > { %3238 = vmatprep.subr.bf16.mxu1 %v3494_v12 }
 0xec8   : > { %3239 = vmatpush3.bf16.msra.mxu1 %v3375_v40 }
 0xec9   : > { %3240 = vmatprep.subr.bf16.mxu1 %v3494_v12 }
 0xecc   : > { %3241 = vmatpush3.bf16.msra.mxu1 %v3376_v42 }
 0xed2   : > { %v2067_v22 = vpop.xlane.xlu1 %2066 }
 0xed3   : > { %3417 = vrcp.f32 %v2067_v22  ;;  %v2526_v22 = vrot.slane %v3975_v52, %v1418_v32 }
 0xed6   : > { %v1730_v23 = vpop.permute.xlu1 %1729 }
 0xed7   : > { %3222 = vmatpush3.msra.mxu0 %v1730_v23 }
 0xed8   : > { %3246 = vmatprep.subr.bf16.mxu0 %v3494_v12 }
 0xedd   : > { %v3418_v24 = vpop.eup %3417 }
 0xede   : > { %v2075_v25 = vmul.f32 %v3418_v24, %v3412_v9 }
 0xee0   : > { %3224 = vmatmul.mubr.msk.f32.vlgmr.msra.gmra.mrb[32].mxu0 %vm923_vm5, %v2075_v25 }
 0xee1   : > { %3250 = vmatprep.mubr.msk.bf16.mxu0 %vm3493_vm0, %v3494_v12  ;;  %3247 = vmatpush3.bf16.msra.mxu0 %v3377_v60 }
 0xee2   : > { %3248 = vmatprep.subr.bf16.mxu0 %v3494_v12 }
 0xee5   : > { %3249 = vmatpush3.bf16.msra.mxu0 %v3378_v7 }
 0xee6   : > { %3254 = vmatprep.subr.bf16.mxu0 %v3494_v12 }
 0xf0b   : > { %v2145_v27 = vpop.f32.mrb[24].mxu1 }
 0xf0c   : > { %v3210_v28 = vpop.f32.mrb[25].mxu1 }
 0xf7e   : > { %v2218_v33 = vpop.f32.mrb[30].mxu0 }
 0xf7f   : > { %2369 = vrot.lane.b32.xlu0 %v2218_v33, %s4119_s29  ;;  %v3215_v34 = vpop.f32.mrb[31].mxu0 }
 0xf82   : > { %v2291_v36 = vpop.f32.mrb[26].mxu1 }
 0xf83   : > { %2373 = vrot.lane.b32.xlu1 %v2291_v36, %s4118_s28  ;;  %v3220_v37 = vpop.f32.mrb[27].mxu1 }
 0xfb3   : > { %v2364_v43 = vpop.f32.mrb[32].mxu0 }
 0xfb4   : > { %2377 = vrot.lane.b32.xlu0 %v2364_v43, %s3495_s27  ;;  %v3225_v44 = vpop.f32.mrb[33].mxu0  ;;  %s359_s27 = sand.u32 1, %s3481_s14  }
 0xfb5   : > { %s360_s11 = scalar_lea.vmem [#allocation2], %s359_s27  ;;  %s2790_s28 = scalar_lea.sflag [#allocation3], %s359_s27 }
 0xfb6   : > { %s2802_s29 = sshll.u32 %s360_s11, 4  ;;  %s4060_s29 = int_to_ptr.vmem [resolvable:$true] %s2802_s29 }
 0xfb7   : > { %s3427_s21 = scalar_lea.vmem %s4060_s29, 16  ;;  %p3434_p1 = scmp.lt.s32.totalorder %s4060_s29, %s3432_s25 }
 0xfb8   : > { %p3428_p12 = scmp.ne.s32.totalorder %s4060_s29, %s3427_s21  ;;  %p3435_p2 = scmp.lt.s32.totalorder %s3433_s26, %s3427_s21 }
 0xfba   : > { %p3429_p13 = pnand %p3428_p12, %p3592_p5  ;;  %p3436_p3 = por %p3435_p2, %p3434_p1 }
 0xfbc   : > { %p3430_p0 = pneg %p3429_p13 }
 0xfbe   : > { %p3437_p4 = pnand %p3436_p3, %p3430_p0 }
 0xff1   : > { %v2370_v45 = vpop.permute.xlu0 %2369 }
 0xff2   : > { %v2380_v47 = vsel %vm514_vm4, %v2145_v27, %v2370_v45  ;;  %v2699_v45 = vld [vmem:[%s4109_s8 + $0x10] sm:$0xff] }
 0xff5   : > { %v2374_v46 = vpop.permute.xlu1 %2373 }
 0xff6   : > { %v2381_v48 = vsel %vm1273_vm6, %v2380_v47, %v2374_v46  ;;  %v2700_v47 = vld [vmem:[%s4109_s8 + $0x18] sm:$0xff] }
0x1026   : > { %v2378_v49 = vpop.permute.xlu0 %2377 }
0x1027   : > { %v2382_v50 = vsel %vm1275_vm7, %v2381_v48, %v2378_v49  ;;  %v3290_v48 = vpack.c.bf16 %v2700_v47, %v2699_v45 }
0x1028   : > { %v2383_v51 = vpack.c.bf16 %v2382_v50, %v2382_v50 }
0x102a   : > { %3243 = vmatmul.mubr.bf16.vlgmr.msra.gmra.mrb[28].mxu1 %v2383_v51 }
0x10fd   : > { %v2487_v3 = vpop.f32.mrb[28].mxu1 }
0x10fe   : > { %v2488_v54 = vadd.f32 %v2487_v3, %v2404_v53  ;;  %v3244_v55 = vpop.f32.mrb[29].mxu1  ;;  %v2681_v53 = vrot.slane %v3975_v52, %v1572_v2 }
0x10ff   : > { %v2490_v56 = vpop.f32.mrb[30].mxu1 }
0x1100   : > { %v3245_v57 = vpop.f32.mrb[31].mxu1  ;;  %v2493_v58 = vadd.f32 %v2488_v54, %v3866_v10  ;;  %v2686_v54 = vrot.slane %v3975_v52, %v1577_v5 }
0x1102   : > { %v2494_v62 = vsel %vm514_vm4, %v2493_v58, 0.0 }
0x1103   : > { %2495 = vadd.xlane.f32.xlu1 %v2494_v62 }
0x1190   : > { %v2496_v63 = vpop.xlane.xlu1 %2495 }
0x1191   : > { %v2497_v0 = vmul.f32 0.03125, %v2496_v63 }
0x1193   : > { %v2498_v1 = vsub.f32 %v2493_v58, %v2497_v0 }
0x1195   : > { %v2499_v6 = vmul.f32 %v2498_v1, %v2498_v1 }
0x1197   : > { %v2500_v15 = vsel %vm514_vm4, %v2499_v6, 0.0 }
0x1198   : > { %2501 = vadd.xlane.f32.xlu0 %v2500_v15 }
0x1225   : > { %v2502_v10 = vpop.xlane.xlu0 %2501 }
0x1226   : > { %v2503_v8 = vmul.f32 0.03125, %v2502_v10 }
0x1228   : > { %v2504_v9 = vadd.f32 1e-05, %v2503_v8 }
0x122a   : > { %3419 = vrsqrt.f32 %v2504_v9 }
0x1234   : > { %v3420_v13 = vpop.eup %3419 }
0x1235   : > { %v2506_v61 = vmul.f32 %v3420_v13, %v2498_v1 }
0x1237   : > { %v2511_v16 = vmul.f32 %v2510_v11, %v2506_v61 }
0x1239   : > { %v2516_v17 = vadd.f32 %v2515_v26, %v2511_v16 }
0x123b   : > { %v2517_v21 = vpack.c.bf16 %v2516_v17, %v2516_v17 }
0x123d   : > { %3251 = vmatmul.mubr.msk.bf16.vlgmr.msra.gmra.mrb[36].mxu0 %vm514_vm4, %v2517_v21 }
0x123e   : > { %3255 = vmatpush3.bf16.msra.mxu0 %v3379_v20  ;;  %3262 = vmatprep.mubr.msk.bf16.mxu0 %vm3493_vm0, %v3494_v12 }
0x123f   : > { %3256 = vmatprep.subr.bf16.mxu0 %v3494_v12 }
0x1242   : > { %3257 = vmatpush3.bf16.msra.mxu0 %v3380_v18 }
0x1243   : > { %3258 = vmatprep.subr.bf16.mxu0 %v3494_v12 }
0x1246   : > { %3259 = vmatpush3.bf16.msra.mxu0 %v3381_v19 }
0x1247   : > { %3260 = vmatprep.subr.bf16.mxu0 %v3494_v12 }
0x124a   : > { %3261 = vmatpush3.bf16.msra.mxu0 %v3382_v14 }
0x124b   : > { %3286 = vmatprep.subr.bf16.mxu0 %v3492_v4 }
0x1310   : > { %v2576_v23 = vpop.f32.mrb[36].mxu0 }
0x1311   : > { %v2577_v24 = vadd.f32 %v2576_v23, %v2526_v22  ;;  %v3252_v25 = vpop.f32.mrb[37].mxu0 }
0x1312   : > { %v2579_v27 = vpop.f32.mrb[38].mxu0 }
0x1313   : > { %v2582_v28 = vmax.f32 %v2577_v24, 0.0  ;;  %v3253_v29 = vpop.f32.mrb[39].mxu0 }
0x1315   : > { %v2583_v30 = vpack.c.bf16 %v2582_v28, %v2582_v28 }
0x1317   : > { %3263 = vmatmul.mubr.msk.bf16.vlgmr.msra.gmra.mrb[40].mxu0 %vm1273_vm6, %v2583_v30 }
0x1318   : > { %3274 = vmatprep.mubr.msk.f32.mxu0 %vm3493_vm0, %v3494_v12  ;;  %v2697_v12 = vld [vmem:[%s4109_s8] sm:$0xff] }
0x1319   : > { %v3287_v46 = vpack.c.bf16 %v2698_v41, %v2697_v12 }
0x131b   : > { %3288 = vmatpush3.bf16.msra.mxu0 %v3287_v46 }
0x131c   : > { %3289 = vmatprep.subr.bf16.mxu0 %v3492_v4 }
0x131f   : > { %3291 = vmatpush3.bf16.msra.mxu0 %v3290_v48 }
0x13ea   : > { %v2658_v33 = vpop.f32.mrb[40].mxu0 }
0x13eb   : > { %v2659_v34 = vadd.f32 %v2658_v33, %v2596_v31  ;;  %v3264_v35 = vpop.f32.mrb[41].mxu0 }
0x13ec   : > { %v2661_v32 = vpop.f32.mrb[42].mxu0 }
0x13ed   : > { %v3265_v36 = vpop.f32.mrb[43].mxu0  ;;  %v2664_v37 = vadd.f32 %v2659_v34, %v2516_v17 }
0x13ef   : > { %v2665_v38 = vsel %vm514_vm4, %v2664_v37, 0.0 }
0x13f0   : > { %2666 = vadd.xlane.f32.xlu0 %v2665_v38 }
0x147d   : > { %v2667_v39 = vpop.xlane.xlu0 %2666 }
0x147e   : > { %v2668_v40 = vmul.f32 0.03125, %v2667_v39 }
0x1480   : > { %v2669_v42 = vsub.f32 %v2664_v37, %v2668_v40 }
0x1482   : > { %v2670_v43 = vmul.f32 %v2669_v42, %v2669_v42 }
0x1484   : > { %v2671_v44 = vsel %vm514_vm4, %v2670_v43, 0.0 }
0x1485   : > { %2672 = vadd.xlane.f32.xlu1 %v2671_v44 }
0x1512   : > { %v2673_v49 = vpop.xlane.xlu1 %2672 }
0x1513   : > { %v2674_v50 = vmul.f32 0.03125, %v2673_v49 }
0x1515   : > { %v2675_v51 = vadd.f32 1e-05, %v2674_v50 }
0x1517   : > { %3421 = vrsqrt.f32 %v2675_v51 }
0x1521   : > { %v3422_v3 = vpop.eup %3421 }
0x1522   : > { %v2677_v55 = vmul.f32 %v3422_v3, %v2669_v42 }
0x1524   : > { %v2682_v56 = vmul.f32 %v2681_v53, %v2677_v55 }
0x1526   : > { %v2687_v57 = vadd.f32 %v2686_v54, %v2682_v56 }
0x1528   : > { %v2688_v58 = vsel %vm514_vm4, %v2687_v57, 0.0 }
0x1529   : > { %v2689_v4 = vrot.slane %v2688_v58, 4 }
0x152b   : > { %v2690_v62 = vadd.f32 %v2689_v4, %v2688_v58 }
0x152d   : > { %v2691_v63 = vrot.slane %v2690_v62, 2 }
0x152f   : > { %v2692_v0 = vadd.f32 %v2691_v63, %v2690_v62 }
0x1531   : > { %v2693_v1 = vrot.slane %v2692_v0, 1 }
0x1533   : > { %v2694_v6 = vadd.f32 %v2693_v1, %v2692_v0 }
0x1535   : > { %v2696_v15 = vmul.f32 0.125, %v2694_v6 }
0x1537   : > { %3275 = vmatmul.mubr.msk.f32.vlgmr.msra.gmra.mrb[34].mxu0 %vm514_vm4, %v2696_v15 }
0x160a   : > { %v2771_v2 = vpop.f32.mrb[34].mxu0 }
0x160b   : > { %v2772_v5 = vadd.f32 %v2771_v2, %v2701_v59  ;;  %v3276_v52 = vpop.f32.mrb[35].mxu0 }
0x160d   : > { %v2776_v60 = vsel %vm2775_vm8, %v2772_v5, -inf }
0x160e   : > { %2777 = vmax.xlane.f32.xlu0 %v2776_v60 }
0x169b   : > { %v2778_v7 = vpop.xlane.xlu0 %2777 }
0x169c   : > { %v2779_v10 = vsub.f32 %v2772_v5, %v2778_v7 }
0x169e   : > { %v2780_v8 = vmul.f32 1.442695, %v2779_v10 }
0x16a0   : > { %3423 = vpow2.f32 %v2780_v8 }
0x16aa   : > { %v3424_v9 = vpop.eup %3423 }
0x16ab   : > { %v2782_v11 = vsel %vm2775_vm8, %v3424_v9, 0.0 }
0x16ac   : > { %2783 = vadd.xlane.f32.xlu1 %v2782_v11 }
0x1739   : > { %v2784_v13 = vpop.xlane.xlu1 %2783 }
0x173a   : > { %3425 = vlog2.f32 %v2784_v13 }
0x1744   : > { %v3426_v61 = vpop.eup %3425 }
0x1745   : > { %v2786_v26 = vmul.f32 0.6931472, %v3426_v61 }
0x1747   : > { %v2787_v16 = vsub.f32 %v2779_v10, %v2786_v26 }
0x1749   : > { %2788 = vst.msk [vmem:[%s360_s11] sm:$0x1] %vm2775_vm8, %v2787_v16 }
0x174a   : > { %3440 = shalt.err (!%p3437_p4)
}
0x174b   : > { %s3441_s27 = scalar_lea.hbm %s4058_s20, 16  ;;  %s3445_s12 = scalar_lea.hbm %s4111_s10, 32 }
0x174c   : > { %p3442_p7 = scmp.ne.s32.totalorder %s4058_s20, %s3441_s27  ;;  %p3446_p10 = scmp.lt.u32.totalorder %s4058_s20, %s4111_s10 }
0x174d   : > { %p3447_p11 = scmp.lt.u32.totalorder %s3445_s12, %s3441_s27  ;;  %p3449_p13 = scmp.lt.u32.totalorder %s3441_s27, %s4058_s20 }
0x174e   : > { %p3443_p8 = pnand %p3442_p7, %p3592_p5 }
0x174f   : > { %p3448_p12 = por %p3447_p11, %p3446_p10 }
0x1750   : > { %p3444_p9 = pneg %p3443_p8 }
0x1751   : > { %p3450_p0 = por %p3449_p13, %p3448_p12 }
0x1753   : > { %p3451_p1 = pnand %p3450_p0, %p3444_p9 }
0x1755   : > { %3454 = shalt.err (!%p3451_p1)
}
0x1756   : > { %3292 = dma.vmem_to_hbm [thread:$0]  (%p3592_p5), %s4060_s29, 16, %s4058_s20, %s2790_s28  }
0x1757 PF: > { %p3298_p2 = scmp.ge.s32.totalorder %s3489_s16, 2  ;;  %s2814_s21 = sand.u32 1, %s3477_s13  }
0x1758   : > { %s2815_s25 = scalar_lea.sflag [#allocation3], %s2814_s21 }
0x1759   : > { %p3295_p3 = pnand %p3298_p2, %p3596_p6 }
0x175b   : > { %3472 = dma.done.wait (!%p3295_p3), %s2815_s25, 16  }
0x175c   : > { %3474 = vsyncadd (!%p3295_p3), %s2815_s25, 4294967280  ;;  %p20_p4 = scmp.ge.s32.totalorder %s3579_s19, 4   ;;  %s4120_s13 = smov %s3481_s14 }
0x175d   : > { %s4121_s14 = smov %s3485_s15  ;;  %s4122_s15 = smov %s3590_s22 }
0x175e   : > { %s4123_s16 = smov %s3579_s19  ;;  %22 = sbr.rel (!%p20_p4) target bundleno = 3 (0x3), region = 103 }
0x1765   :  { %2819 = vsyncpa [#allocation3], 1 }
0x1766   :  { %2821 = vsyncpa [#allocation3 + $0x1], 1 }

</bundles_post_ra>
